<compile_context>
chip_gen: v7x
topology: tpu7x:2x2x1
jax: 0.10.0
libtpu: 0.0.40
codegen_flags: <defaults>
</compile_context>

<pallas_src>
import functools
import math

import jax
import jax.numpy as jnp
from jax.experimental import pallas as pl
from jax.experimental.pallas import tpu as pltpu


# ----------------------------------------------------------------------------
# Kernel
# ----------------------------------------------------------------------------
def _sdpa_kernel(*refs, inv_temperature, has_mask, has_amask, return_attn,
                 kv_full_heads, h_block, head_axis, compute_dtype):
    it = iter(refs)
    q_ref = next(it)
    k_ref = next(it)
    v_ref = next(it)
    mask_ref = next(it) if has_mask else None
    amask_ref = next(it) if has_amask else None
    out_ref = next(it)
    attn_ref = next(it) if return_attn else None

    # Scale q (O(tq*d)) inside the kernel instead of the (tq,Lk) scores.
    q = q_ref[0].astype(jnp.float32) * jnp.float32(inv_temperature)
    q = q.astype(compute_dtype)

    if kv_full_heads:
        # K/V blocks carry all H heads (resident across the inner grid axes);
        # slice out this step's head block.
        h0 = pl.multiple_of(pl.program_id(head_axis) * h_block, h_block)
        k = k_ref[0, pl.ds(h0, h_block)]
        v = v_ref[0, pl.ds(h0, h_block)]
    else:
        k = k_ref[0]
        v = v_ref[0]
    k = k.astype(compute_dtype)
    v = v.astype(compute_dtype)

    # q @ k^T: contract the last dims directly (no explicit transpose), f32 acc.
    scores = jnp.einsum("hqd,hkd->hqk", q, k, preferred_element_type=jnp.float32)

    if has_mask:
        scores = scores + mask_ref[0].astype(jnp.float32)
    if has_amask:
        # int8 flag == 1 where the original attn_mask == -1 (fill -1e-9, verbatim
        # from the PyTorch source).
        scores = jnp.where(amask_ref[0] != 0, jnp.float32(-1e-9), scores)

    # Numerically stable softmax over the full Lk extent (exact, single pass).
    s_max = jnp.max(scores, axis=-1, keepdims=True)
    p = jnp.exp(scores - s_max)
    denom = jnp.sum(p, axis=-1, keepdims=True)
    inv = pl.reciprocal(denom, approx=True)            # EUP slot
    inv = inv * (jnp.float32(2.0) - denom * inv)        # 2 Newton steps -> f32 acc.
    inv = inv * (jnp.float32(2.0) - denom * inv)
    attn = p * inv

    out = jnp.einsum("hqk,hkd->hqd", attn.astype(compute_dtype), v,
                     preferred_element_type=jnp.float32)

    out_ref[0] = out.astype(out_ref.dtype)
    if return_attn:
        attn_ref[0] = attn.astype(attn_ref.dtype)


# ----------------------------------------------------------------------------
# Sizing helpers
# ----------------------------------------------------------------------------
def _round_up(x, m):
    return (x + m - 1) // m * m


def _padded_bytes(shape, dtype):
    """VMEM footprint of a tile including lane(128)/sublane(8*packing) padding."""
    dtype = jnp.dtype(dtype)
    packing = max(1, 4 // dtype.itemsize)
    dims = [int(s) for s in shape]
    if dims:
        dims[-1] = _round_up(dims[-1], 128)
    if len(dims) >= 2:
        dims[-2] = _round_up(dims[-2], 8 * packing)
    n = 1
    for s in dims:
        n *= s
    return n * dtype.itemsize


def _vmem_capacity_bytes():
    try:
        cap = int(pltpu.get_tpu_info().vmem_capacity_bytes)
        if cap > 0:
            return cap
    except Exception:
        pass
    return 64 * 2**20   # conservative fallback (v7x per-TC VMEM)


def _vmem_estimate(h_block, tq, *, H, Lk, d, dv, q_dtype, k_dtype, v_dtype,
                   out_dtype, attn_dtype, compute_dtype, mask_dtype,
                   mask_h, amask_h, return_attn, kv_full_heads):
    kv_h = H if kv_full_heads else h_block
    io = _padded_bytes((h_block, tq, d), q_dtype)
    io += _padded_bytes((kv_h, Lk, d), k_dtype)
    io += _padded_bytes((kv_h, Lk, dv), v_dtype)
    io += _padded_bytes((h_block, tq, dv), out_dtype)
    if return_attn:
        io += _padded_bytes((h_block, tq, Lk), attn_dtype)
    if mask_h:
        io += _padded_bytes((1 if mask_h == 1 else h_block, tq, Lk), mask_dtype)
    if amask_h:
        io += _padded_bytes((1 if amask_h == 1 else h_block, tq, Lk), jnp.int8)
    est = 2 * io                                         # double-buffered pipeline
    # live score-path temporaries (scores / p / select / spare) in f32 plus the
    # compute-dtype casts of attn, q, k, v
    est += 4 * _padded_bytes((h_block, tq, Lk), jnp.float32)
    est += _padded_bytes((h_block, tq, Lk), compute_dtype)
    est += _padded_bytes((h_block, tq, d), compute_dtype)
    est += _padded_bytes((h_block, Lk, d), compute_dtype)
    est += _padded_bytes((h_block, Lk, dv), compute_dtype)
    return est


def _broadcast_keep_heads(m, B, H, Lq, Lk):
    """Broadcast a user mask to (B, h, Lq, Lk) where h is 1 (head-shared) or H."""
    m = jnp.asarray(m)
    while m.ndim < 4:
        m = m[None]
    target_h = H if m.shape[1] == H else 1
    return jnp.broadcast_to(m, (B, target_h, Lq, Lk)), target_h


# ----------------------------------------------------------------------------
# Wrapper
# ----------------------------------------------------------------------------
def scaled_dot_product_attention(q, k, v, mask=None, attn_mask=None, *,
                                 temperature, return_attn=True,
                                 attn_dtype=None, compute_dtype=None,
                                 max_heads_per_block=None):
    """q: (B,H,Lq,d), k: (B,H,Lk,d), v: (B,H,Lk,dv).

    Returns (output, attn) like the PyTorch module, or just output when
    return_attn=False.  compute_dtype defaults to bfloat16 (MXU-native on all
    TPU generations, f32 accumulation); pass jnp.float32 for a bit-faithful
    path.  attn_dtype defaults to bfloat16 to halve the attn HBM writeback.
    max_heads_per_block is an optional tuning/testing cap on the head tile.
    """
    compute_dtype = jnp.dtype(jnp.bfloat16 if compute_dtype is None else compute_dtype)
    attn_dtype = jnp.dtype(jnp.bfloat16 if attn_dtype is None else attn_dtype)
    mask_dtype = jnp.dtype(jnp.bfloat16) if compute_dtype == jnp.bfloat16 else jnp.dtype(jnp.float32)

    B, H, Lq, d = q.shape
    Lk = k.shape[2]
    dv = v.shape[3]
    out_dtype = q.dtype

    has_mask = mask is not None
    has_amask = attn_mask is not None

    # --- operand prep: head-shared masks stay (B,1,Lq,Lk); attn_mask -> int8 flag
    mask_arr = amask_arr = None
    mask_h = amask_h = 0
    if has_mask:
        mask_arr, mask_h = _broadcast_keep_heads(mask, B, H, Lq, Lk)
        mask_arr = mask_arr.astype(mask_dtype)
    if has_amask:
        amask_arr, amask_h = _broadcast_keep_heads(attn_mask, B, H, Lq, Lk)
        amask_arr = (amask_arr == -1).astype(jnp.int8)

    # head-shared masks benefit from head-innermost ordering (mask stays resident);
    # otherwise q-innermost ordering keeps K/V resident instead.
    mask_reuse_order = (has_mask and mask_h == 1) or (has_amask and amask_h == 1)

    # --- generation-aware VMEM budget -----------------------------------------
    vmem_cap = _vmem_capacity_bytes()
    budget = int(0.55 * vmem_cap)

    # full-head K/V residency (masked / head-innermost path only)
    kv_full_bytes = 2 * (_padded_bytes((H, Lk, d), k.dtype)
                         + _padded_bytes((H, Lk, dv), v.dtype))
    kv_full_heads = bool(mask_reuse_order and kv_full_bytes <= budget * 0.35)

    est_fn = functools.partial(
        _vmem_estimate, H=H, Lk=Lk, d=d, dv=dv, q_dtype=q.dtype,
        k_dtype=k.dtype, v_dtype=v.dtype, out_dtype=out_dtype,
        attn_dtype=attn_dtype, compute_dtype=compute_dtype,
        mask_dtype=mask_dtype, mask_h=mask_h, amask_h=amask_h,
        return_attn=return_attn, kv_full_heads=kv_full_heads)

    # --- VMEM-budget-driven (Hblk, tq) selection -------------------------------
    h_cap = H if max_heads_per_block is None else max(1, int(max_heads_per_block))
    tq_cap = min(512, _round_up(Lq, 32))
    tq_opts = list(range(tq_cap, 31, -32))
    h_opts = [h for h in range(min(H, h_cap), 0, -1) if H % h == 0]
    best = None
    for hb in h_opts:
        for tq_c in tq_opts:
            e = est_fn(hb, tq_c)
            if e <= budget:
                score = (hb * tq_c, tq_c)
                if best is None or score > best[0]:
                    best = (score, hb, tq_c, e)
    if best is None:
        h_block, tq = 1, 32              # best effort for extreme Lk
        est = est_fn(h_block, tq)
    else:
        _, h_block, tq, est = best

    Lq_pad = _round_up(Lq, tq)
    nq = Lq_pad // tq
    nh = H // h_block

    # v7x has two TensorCores: keep the parallel grid extent >= 2 when possible.
    if B * nq * nh == 1 and H > 1:
        for hb in range(h_block - 1, 0, -1):
            if H % hb == 0:
                h_block = hb
                break
        nh = H // h_block
        est = est_fn(h_block, tq)
    if nh == 1:
        kv_full_heads = False            # already resident; no in-kernel slicing

    # --- pad Lq so any q-length tiles cleanly (padded rows sliced off outputs) --
    if Lq_pad != Lq:
        qpad = Lq_pad - Lq
        q = jnp.pad(q, ((0, 0), (0, 0), (0, qpad), (0, 0)))
        if has_mask:
            mask_arr = jnp.pad(mask_arr, ((0, 0), (0, 0), (0, qpad), (0, 0)))
        if has_amask:
            amask_arr = jnp.pad(amask_arr, ((0, 0), (0, 0), (0, qpad), (0, 0)))

    # --- grid ordering and BlockSpecs ------------------------------------------
    if mask_reuse_order:
        grid = (B, nq, nh)               # head axis innermost: mask stays resident
        head_axis = 2
        q_map = lambda b, qi, hb: (b, hb, qi, 0)
        if kv_full_heads:
            kv_map = lambda b, qi, hb: (b, 0, 0, 0)   # resident across qi AND heads
            kv_hblk = H
        else:
            kv_map = lambda b, qi, hb: (b, hb, 0, 0)
            kv_hblk = h_block
        mask_map_shared = lambda b, qi, hb: (b, 0, qi, 0)
        mask_map_perhead = lambda b, qi, hb: (b, hb, qi, 0)
    else:
        grid = (B, nh, nq)               # q axis innermost: K/V stay resident
        head_axis = 1
        q_map = lambda b, hb, qi: (b, hb, qi, 0)
        kv_map = lambda b, hb, qi: (b, hb, 0, 0)
        kv_hblk = h_block
        mask_map_shared = lambda b, hb, qi: (b, 0, qi, 0)
        mask_map_perhead = lambda b, hb, qi: (b, hb, qi, 0)

    in_specs = [
        pl.BlockSpec((1, h_block, tq, d), q_map),
        pl.BlockSpec((1, kv_hblk, Lk, d), kv_map),
        pl.BlockSpec((1, kv_hblk, Lk, dv), kv_map),
    ]
    inputs = [q, k, v]
    if has_mask:
        mh_blk = 1 if mask_h == 1 else h_block
        in_specs.append(pl.BlockSpec(
            (1, mh_blk, tq, Lk), mask_map_shared if mask_h == 1 else mask_map_perhead))
        inputs.append(mask_arr)
    if has_amask:
        amh_blk = 1 if amask_h == 1 else h_block
        in_specs.append(pl.BlockSpec(
            (1, amh_blk, tq, Lk), mask_map_shared if amask_h == 1 else mask_map_perhead))
        inputs.append(amask_arr)

    out_spec = pl.BlockSpec((1, h_block, tq, dv), q_map)
    out_sds = jax.ShapeDtypeStruct((B, H, Lq_pad, dv), out_dtype)
    if return_attn:
        out_specs = (out_spec, pl.BlockSpec((1, h_block, tq, Lk), q_map))
        out_shape = (out_sds, jax.ShapeDtypeStruct((B, H, Lq_pad, Lk), attn_dtype))
    else:
        out_specs = out_spec
        out_shape = out_sds

    # --- scoped VMEM limit clamped to physical capacity -------------------------
    vmem_limit = int(min(0.9 * vmem_cap, max(32 * 2**20, est * 3 // 2)))

    # --- advisory cost estimate for XLA's scheduler -----------------------------
    flops = 2 * B * H * Lq * Lk * (d + dv)
    transcendentals = B * H * Lq * Lk
    bytes_accessed = sum(int(x.size) * jnp.dtype(x.dtype).itemsize for x in inputs)
    bytes_accessed += B * H * Lq_pad * dv * jnp.dtype(out_dtype).itemsize
    if return_attn:
        bytes_accessed += B * H * Lq_pad * Lk * attn_dtype.itemsize
    cost = pl.CostEstimate(flops=int(flops), transcendentals=int(transcendentals),
                           bytes_accessed=int(bytes_accessed))

    kernel = functools.partial(
        _sdpa_kernel,
        inv_temperature=float(1.0 / float(temperature)),
        has_mask=has_mask, has_amask=has_amask, return_attn=return_attn,
        kv_full_heads=kv_full_heads, h_block=h_block, head_axis=head_axis,
        compute_dtype=compute_dtype)

    result = pl.pallas_call(
        kernel,
        out_shape=out_shape,
        grid=grid,
        in_specs=in_specs,
        out_specs=out_specs,
        compiler_params=pltpu.CompilerParams(
            dimension_semantics=("parallel", "parallel", "parallel"),
            vmem_limit_bytes=vmem_limit),
        cost_estimate=cost,
    )(*inputs)

    if return_attn:
        out, attn = result
        if Lq_pad != Lq:
            out = out[:, :, :Lq]
            attn = attn[:, :, :Lq]
        return out, attn
    out = result
    if Lq_pad != Lq:
        out = out[:, :, :Lq]
    return out


# ----------------------------------------------------------------------------
# Reference + self-test
# ----------------------------------------------------------------------------
def _reference(q, k, v, mask, attn_mask, temperature):
    scores = jnp.einsum("bhqd,bhkd->bhqk", q, k) / temperature
    if mask is not None:
        scores = scores + mask
    if attn_mask is not None:
        scores = jnp.where(attn_mask == -1, jnp.float32(-1e-9), scores)
    attn = jax.nn.softmax(scores, axis=-1)
    out = jnp.einsum("bhqk,bhkd->bhqd", attn, v)
    return out, attn


if __name__ == "__main__":
    B, H, L, D = 2, 4, 16, 32
    temperature = math.sqrt(D)

    key = jax.random.PRNGKey(0)
    kq, kk, kv_, km, ka = jax.random.split(key, 5)

    q = jax.random.normal(kq, (B, H, L, D), jnp.float32)
    k = jax.random.normal(kk, (B, H, L, D), jnp.float32)
    v = jax.random.normal(kv_, (B, H, L, D), jnp.float32)
    # additive pairwise bias mask, head-shared (as in the parent module)
    mask = jax.random.normal(km, (B, 1, L, L), jnp.float32) * 0.1
    # attn_mask with some -1 entries
    attn_mask = jnp.where(
        jax.random.uniform(ka, (B, 1, L, L)) < 0.2, -1.0, 1.0).astype(jnp.float32)

    ref_out, ref_attn = _reference(q, k, v, mask, attn_mask, temperature)
    ref_out_nm, ref_attn_nm = _reference(q, k, v, None, None, temperature)
    ref_out_m, _ = _reference(q, k, v, mask, None, temperature)

    # 1) bit-faithful path: f32 compute, f32 attn, both masks
    out, attn = scaled_dot_product_attention(
        q, k, v, mask=mask, attn_mask=attn_mask, temperature=temperature,
        compute_dtype=jnp.float32, attn_dtype=jnp.float32)
    out = jax.block_until_ready(out)
    attn = jax.block_until_ready(attn)
    assert jnp.allclose(out, ref_out, atol=1e-5, rtol=1e-5)
    assert jnp.allclose(attn, ref_attn, atol=1e-5, rtol=1e-5)

    # 2) default fast path (bf16 matmuls, bf16 attn), no masks (K/V-resident order)
    out2, attn2 = scaled_dot_product_attention(q, k, v, temperature=temperature)
    out2 = jax.block_until_ready(out2)
    attn2 = jax.block_until_ready(attn2)
    assert jnp.allclose(out2, ref_out_nm, atol=3e-2, rtol=3e-2)
    assert jnp.allclose(attn2.astype(jnp.float32), ref_attn_nm, atol=3e-2, rtol=3e-2)

    # 3) attn writeback dropped entirely (return_attn=False), additive mask only
    out3 = scaled_dot_product_attention(
        q, k, v, mask=mask, temperature=temperature, return_attn=False)
    out3 = jax.block_until_ready(out3)
    assert jnp.allclose(out3, ref_out_m, atol=3e-2, rtol=3e-2)

    # 4) exercise the full-head-resident K/V path (head tile capped below H)
    out4, attn4 = scaled_dot_product_attention(
        q, k, v, mask=mask, attn_mask=attn_mask, temperature=temperature,
        compute_dtype=jnp.float32, attn_dtype=jnp.float32, max_heads_per_block=2)
    out4 = jax.block_until_ready(out4)
    attn4 = jax.block_until_ready(attn4)
    assert jnp.allclose(out4, ref_out, atol=1e-5, rtol=1e-5)
    assert jnp.allclose(attn4, ref_attn, atol=1e-5, rtol=1e-5)

    print("KERNEL_OK")
</pallas_src>

<mosaic_0001>
module attributes {stable_mosaic.version = 11 : i64} {
  func.func @_sdpa_kernel(%arg0: i32, %arg1: i32, %arg2: i32, %arg3: memref<1x4x32x32xf32, #tpu.memory_space<vmem>>, %arg4: memref<1x4x16x32xf32, #tpu.memory_space<vmem>>, %arg5: memref<1x4x16x32xf32, #tpu.memory_space<vmem>>, %arg6: memref<1x1x32x16xf32, #tpu.memory_space<vmem>>, %arg7: memref<1x1x32x16xi8, #tpu.memory_space<vmem>>, %arg8: memref<1x4x32x32xf32, #tpu.memory_space<vmem>>, %arg9: memref<1x4x32x16xf32, #tpu.memory_space<vmem>>) attributes {dimension_semantics = [#tpu.dimension_semantics<parallel>, #tpu.dimension_semantics<parallel>, #tpu.dimension_semantics<parallel>], iteration_bounds = array<i64: 2, 1, 1>, scalar_prefetch = 0 : i64, scratch_operands = 0 : i64, tpu.core_type = #tpu.core_type<tc>, window_params = [{transform_indices = @transform_0, window_bounds = array<i64: 1, 4, 32, 32>}, {transform_indices = @transform_1, window_bounds = array<i64: 1, 4, 16, 32>}, {transform_indices = @transform_2, window_bounds = array<i64: 1, 4, 16, 32>}, {transform_indices = @transform_3, window_bounds = array<i64: 1, 1, 32, 16>}, {transform_indices = @transform_4, window_bounds = array<i64: 1, 1, 32, 16>}, {transform_indices = @transform_5, window_bounds = array<i64: 1, 4, 32, 32>}, {transform_indices = @transform_6, window_bounds = array<i64: 1, 4, 32, 16>}]} {
    %c0 = arith.constant 0 : index
    %c0_0 = arith.constant 0 : index
    %c0_1 = arith.constant 0 : index
    %c0_2 = arith.constant 0 : index
    %0 = vector.load %arg3[%c0, %c0_0, %c0_1, %c0_2] : memref<1x4x32x32xf32, #tpu.memory_space<vmem>>, vector<1x4x32x32xf32>
    %1 = vector.shape_cast %0 : vector<1x4x32x32xf32> to vector<4x32x32xf32>
    %cst = arith.constant 0.176776692 : f32
    %2 = vector.broadcast %cst : f32 to vector<4x32x32xf32>
    %3 = arith.mulf %1, %2 : vector<4x32x32xf32>
    %c0_3 = arith.constant 0 : index
    %c0_4 = arith.constant 0 : index
    %c0_5 = arith.constant 0 : index
    %c0_6 = arith.constant 0 : index
    %4 = vector.load %arg4[%c0_3, %c0_4, %c0_5, %c0_6] : memref<1x4x16x32xf32, #tpu.memory_space<vmem>>, vector<1x4x16x32xf32>
    %5 = vector.shape_cast %4 : vector<1x4x16x32xf32> to vector<4x16x32xf32>
    %c0_7 = arith.constant 0 : index
    %c0_8 = arith.constant 0 : index
    %c0_9 = arith.constant 0 : index
    %c0_10 = arith.constant 0 : index
    %6 = vector.load %arg5[%c0_7, %c0_8, %c0_9, %c0_10] : memref<1x4x16x32xf32, #tpu.memory_space<vmem>>, vector<1x4x16x32xf32>
    %7 = vector.shape_cast %6 : vector<1x4x16x32xf32> to vector<4x16x32xf32>
    "tpu.trace_start"() <{level = 10 : i32, message = "hqd,hkd->hqk"}> : () -> ()
    %cst_11 = arith.constant dense<0.000000e+00> : vector<4x32x16xf32>
    %8 = tpu.matmul %3, %5, %cst_11 {dimension_numbers = #tpu.dot_dimension_numbers<[2], [2], [1], [1], [0, 0, 0, 1, 1, 1], [0], [0]>} : vector<4x32x32xf32>, vector<4x16x32xf32>, vector<4x32x16xf32> -> vector<4x32x16xf32>
    "tpu.trace_stop"() : () -> ()
    %c0_12 = arith.constant 0 : index
    %c0_13 = arith.constant 0 : index
    %c0_14 = arith.constant 0 : index
    %c0_15 = arith.constant 0 : index
    %9 = vector.load %arg6[%c0_12, %c0_13, %c0_14, %c0_15] : memref<1x1x32x16xf32, #tpu.memory_space<vmem>>, vector<1x1x32x16xf32>
    %10 = vector.shape_cast %9 : vector<1x1x32x16xf32> to vector<1x32x16xf32>
    %11 = vector.broadcast %10 : vector<1x32x16xf32> to vector<4x32x16xf32>
    %12 = arith.addf %8, %11 : vector<4x32x16xf32>
    %c0_16 = arith.constant 0 : index
    %c0_17 = arith.constant 0 : index
    %c0_18 = arith.constant 0 : index
    %c0_19 = arith.constant 0 : index
    %13 = vector.load %arg7[%c0_16, %c0_17, %c0_18, %c0_19] : memref<1x1x32x16xi8, #tpu.memory_space<vmem>>, vector<1x1x32x16xi8>
    %14 = vector.shape_cast %13 : vector<1x1x32x16xi8> to vector<1x32x16xi8>
    %c0_i8 = arith.constant 0 : i8
    %15 = vector.broadcast %c0_i8 : i8 to vector<1x32x16xi8>
    %16 = arith.cmpi ne, %14, %15 : vector<1x32x16xi8>
    %cst_20 = arith.constant -9.99999971E-10 : f32
    %17 = vector.shape_cast %16 : vector<1x32x16xi1> to vector<1x32x16xi1>
    %18 = vector.broadcast %17 : vector<1x32x16xi1> to vector<4x32x16xi1>
    %19 = vector.broadcast %cst_20 : f32 to vector<4x32x16xf32>
    %20 = arith.select %18, %19, %12 : vector<4x32x16xi1>, vector<4x32x16xf32>
    %cst_21 = arith.constant dense<0xFF800000> : vector<4x32xf32>
    %21 = vector.multi_reduction <maximumf>, %20, %cst_21 [2] : vector<4x32x16xf32> to vector<4x32xf32>
    %22 = vector.shape_cast %21 : vector<4x32xf32> to vector<4x32x1xf32>
    %23 = vector.broadcast %22 : vector<4x32x1xf32> to vector<4x32x16xf32>
    %24 = arith.subf %20, %23 : vector<4x32x16xf32>
    %25 = math.exp %24 : vector<4x32x16xf32>
    %cst_22 = arith.constant dense<0.000000e+00> : vector<4x32xf32>
    %26 = vector.multi_reduction <add>, %25, %cst_22 [2] : vector<4x32x16xf32> to vector<4x32xf32>
    %27 = vector.shape_cast %26 : vector<4x32xf32> to vector<4x32x1xf32>
    %28 = tpu.reciprocal %27 {approx = true} : vector<4x32x1xf32> -> vector<4x32x1xf32>
    %29 = arith.mulf %27, %28 : vector<4x32x1xf32>
    %cst_23 = arith.constant 2.000000e+00 : f32
    %30 = vector.broadcast %cst_23 : f32 to vector<4x32x1xf32>
    %31 = arith.subf %30, %29 : vector<4x32x1xf32>
    %32 = arith.mulf %28, %31 : vector<4x32x1xf32>
    %33 = arith.mulf %27, %32 : vector<4x32x1xf32>
    %cst_24 = arith.constant 2.000000e+00 : f32
    %34 = vector.broadcast %cst_24 : f32 to vector<4x32x1xf32>
    %35 = arith.subf %34, %33 : vector<4x32x1xf32>
    %36 = arith.mulf %32, %35 : vector<4x32x1xf32>
    %37 = vector.broadcast %36 : vector<4x32x1xf32> to vector<4x32x16xf32>
    %38 = arith.mulf %25, %37 : vector<4x32x16xf32>
    "tpu.trace_start"() <{level = 10 : i32, message = "hqk,hkd->hqd"}> : () -> ()
    %cst_25 = arith.constant dense<0.000000e+00> : vector<4x32x32xf32>
    %39 = tpu.matmul %38, %7, %cst_25 {dimension_numbers = #tpu.dot_dimension_numbers<[2], [1], [1], [2], [0, 0, 0, 1, 1, 2], [0], [0]>} : vector<4x32x16xf32>, vector<4x16x32xf32>, vector<4x32x32xf32> -> vector<4x32x32xf32>
    "tpu.trace_stop"() : () -> ()
    %c0_26 = arith.constant 0 : index
    %c0_27 = arith.constant 0 : index
    %c0_28 = arith.constant 0 : index
    %c0_29 = arith.constant 0 : index
    %40 = vector.load %arg8[%c0_26, %c0_27, %c0_28, %c0_29] : memref<1x4x32x32xf32, #tpu.memory_space<vmem>>, vector<1x4x32x32xf32>
    %41 = vector.shape_cast %40 : vector<1x4x32x32xf32> to vector<4x32x32xf32>
    %42 = vector.shape_cast %39 : vector<4x32x32xf32> to vector<1x4x32x32xf32>
    tpu.vector_store %arg8[%c0_26, %c0_27, %c0_28, %c0_29], %42 {strides = array<i32>} : memref<1x4x32x32xf32, #tpu.memory_space<vmem>>, vector<1x4x32x32xf32>,
    %c0_30 = arith.constant 0 : index
    %c0_31 = arith.constant 0 : index
    %c0_32 = arith.constant 0 : index
    %c0_33 = arith.constant 0 : index
    %43 = vector.load %arg9[%c0_30, %c0_31, %c0_32, %c0_33] : memref<1x4x32x16xf32, #tpu.memory_space<vmem>>, vector<1x4x32x16xf32>
    %44 = vector.shape_cast %43 : vector<1x4x32x16xf32> to vector<4x32x16xf32>
    %45 = vector.shape_cast %38 : vector<4x32x16xf32> to vector<1x4x32x16xf32>
    tpu.vector_store %arg9[%c0_30, %c0_31, %c0_32, %c0_33], %45 {strides = array<i32>} : memref<1x4x32x16xf32, #tpu.memory_space<vmem>>, vector<1x4x32x16xf32>,
    return
  }
  func.func @transform_0(%arg0: i32, %arg1: i32, %arg2: i32) -> (i32, i32, i32, i32) {
    %c0_i32 = arith.constant 0 : i32
    %c0_i32_0 = arith.constant 0 : i32
    return %arg0, %arg2, %arg1, %c0_i32 : i32, i32, i32, i32
  }
  func.func @transform_1(%arg0: i32, %arg1: i32, %arg2: i32) -> (i32, i32, i32, i32) {
    %c0_i32 = arith.constant 0 : i32
    %c0_i32_0 = arith.constant 0 : i32
    %c0_i32_1 = arith.constant 0 : i32
    return %arg0, %arg2, %c0_i32, %c0_i32_0 : i32, i32, i32, i32
  }
  func.func @transform_2(%arg0: i32, %arg1: i32, %arg2: i32) -> (i32, i32, i32, i32) {
    %c0_i32 = arith.constant 0 : i32
    %c0_i32_0 = arith.constant 0 : i32
    %c0_i32_1 = arith.constant 0 : i32
    return %arg0, %arg2, %c0_i32, %c0_i32_0 : i32, i32, i32, i32
  }
  func.func @transform_3(%arg0: i32, %arg1: i32, %arg2: i32) -> (i32, i32, i32, i32) {
    %c0_i32 = arith.constant 0 : i32
    %c0_i32_0 = arith.constant 0 : i32
    %c0_i32_1 = arith.constant 0 : i32
    return %arg0, %c0_i32, %arg1, %c0_i32_0 : i32, i32, i32, i32
  }
  func.func @transform_4(%arg0: i32, %arg1: i32, %arg2: i32) -> (i32, i32, i32, i32) {
    %c0_i32 = arith.constant 0 : i32
    %c0_i32_0 = arith.constant 0 : i32
    %c0_i32_1 = arith.constant 0 : i32
    return %arg0, %c0_i32, %arg1, %c0_i32_0 : i32, i32, i32, i32
  }
  func.func @transform_5(%arg0: i32, %arg1: i32, %arg2: i32) -> (i32, i32, i32, i32) {
    %c0_i32 = arith.constant 0 : i32
    %c0_i32_0 = arith.constant 0 : i32
    return %arg0, %arg2, %arg1, %c0_i32 : i32, i32, i32, i32
  }
  func.func @transform_6(%arg0: i32, %arg1: i32, %arg2: i32) -> (i32, i32, i32, i32) {
    %c0_i32 = arith.constant 0 : i32
    %c0_i32_0 = arith.constant 0 : i32
    return %arg0, %arg2, %arg1, %c0_i32 : i32, i32, i32, i32
  }
}

</mosaic_0001>

<bundles_post_ra>
// kernel: tpu_custom_call.1
= control target key start
LH: loop header
LB: loop body
LE: loop exit
PB: predicated region body
PF: predicated region fallthrough
CT: control target
= control target key end

     0   :  { %s3296_s0 = inlined_call_operand.hbm [shape: f32[2,4,32,32], index: 0, kind: input, shape index: {}]   ;;  %s3297_s1 = inlined_call_operand.hbm [shape: f32[2,4,16,32], index: 1, kind: input, shape index: {}]   ;;  %s3298_s2 = inlined_call_operand.hbm [shape: f32[2,4,16,32], index: 2, kind: input, shape index: {}]   ;;  %s3299_s3 = inlined_call_operand.vmem [shape: f32[2,1,32,16], index: 3, kind: input, shape index: {}]   ;;  %s3300_s4 = inlined_call_operand.vmem [shape: s8[2,1,32,16], index: 4, kind: input, shape index: {}]   ;;  %s3301_s5 = inlined_call_operand.hbm [shape: f32[2,4,32,32], index: 5, kind: output, shape index: {0}]   ;;  %s3302_s6 = inlined_call_operand.vmem [shape: f32[2,4,32,16], index: 6, kind: output, shape index: {1}]  }
   0x1   :  { %3314 = sst [smem:[#allocation17_spill]] %s3297_s1 }
   0x2   :  { %3315 = sst [smem:[#allocation18_spill]] %s3301_s5 }
   0x3   :  { %12 = vsyncpa [#allocation3], 0 }
   0x4   :  { %14 = vsyncpa [#allocation3 + $0x1], 0 }
   0x5   :  { %15 = vsyncpa [#allocation6], 0 }
   0x6   :  { %17 = vsyncpa [#allocation6 + $0x1], 0 }
   0x7   :  { %18 = vsyncpa [#allocation4], 0 }
   0x8   :  { %20 = vsyncpa [#allocation4 + $0x1], 0  ;;  %s2580_s21 = smov 0   ;;  %s2582_s22 = smov 0  }
   0x9   :  { %s2584_s23 = smov 0   ;;  %s2586_s24 = smov 0  }
   0xa   :  { %s2588_s25 = smov 0   ;;  %s2590_s26 = smov 0  }
   0xb LB: > { %3316 = sst [smem:[#allocation12_spill]] %s2514_s21  ;;  %s2611_s27 = sadd.s32 4294967295, %s2534_s26   ;;  %s2534_s26 = sphi %s2590_s26, %s26_s26   ;;  %s2530_s25 = sphi %s2588_s25, %s3356_s25   ;;  %s2526_s24 = sphi %s2586_s24, %s3355_s24   ;;  %s2522_s23 = sphi %s2584_s23, %s3351_s23   ;;  %s2518_s22 = sphi %s2582_s22, %s3354_s22   ;;  %s2514_s21 = sphi %s2580_s21, %s3353_s21  }
   0xc   : > { %3317 = sst [smem:[#allocation13_spill]] %s2522_s23  ;;  %s1976_s28 = sadd.s32 4294967294, %s2534_s26  }
   0xd   : > { %s45_s29 = sadd.s32 1, %s2530_s25  ;;  %s56_s30 = sadd.s32 1, %s2522_s23 }
   0xe   : > { %p47_p0 = scmp.ge.s32.totalorder %s45_s29, 2  ;;  %p63_p1 = scmp.ne.s32.totalorder %s2522_s23, %s2518_s22 }
   0xf   : > { %p64_p2 = scmp.eq.s32.totalorder %s2534_s26, 0  ;;  %p69_p3 = scmp.ne.s32.totalorder %s2518_s22, %s2514_s21 }
  0x10   : > { %s3358_s29 = smov (%p47_p0, %s45_s29), 0  ;;  %p70_p5 = scmp.eq.s32.totalorder %s2611_s27, 0 }
  0x11   : > { %3318 = sst [smem:[#allocation14_spill]] %s3358_s29  ;;  %p2623_p4 = por %p64_p2, %p63_p1 }
  0x12   : > { %s49_s8 = ssub.s32 %s2530_s25, %s3358_s29  ;;  %p209_p6 = scmp.eq.s32.totalorder %s2611_s27, 1 }
  0x13   : > { %p54_p7 = scmp.eq.s32.totalorder %s49_s8, 0  ;;  %p2631_p8 = por %p70_p5, %p69_p3 }
  0x14   : > { %p2635_p9 = por %p209_p6, %p63_p1  ;;  %p215_p10 = scmp.eq.s32.totalorder %s1976_s28, 1 }
  0x15   : > { %s3320_s9 = scalar_select %p2631_p8, 1, 0 }
  0x16   : > { %s3321_s10 = scalar_select %p2635_p9, 1, 0 }
  0x17   : > { %s2640_s11 = scalar_select %p54_p7, %s2522_s23, %s56_s30  }
  0x18   : > { %p2642_p11 = por %p215_p10, %p69_p3  ;;  %p2239_p13 = scmp.lt.s32.totalorder %s2534_s26, 2 }
  0x19   : > { %3322 = sst [smem:[#allocation15_spill]] %s2640_s11  ;;  %s2649_s13 = sand.u32 1, %s2522_s23  }
  0x1a   : > { %s3323_s12 = scalar_select %p2642_p11, 1, 0 }
  0x1b   : > { %p2653_p0 = pnand %p2239_p13, %p2623_p4  ;;  %s291_s15 = sand.u32 1, %s2534_s26  }
  0x1c   : > { %3324 = sst [smem:[#allocation16_spill]] %s3323_s12  ;;  %s3303_s16 = sshll.u32 %s2649_s13, 6 }
  0x1d   : > { %s3304_s17 = sshll.u32 %s2530_s25, 10  ;;  %s295_s18 = scalar_lea.vmem [#allocation5], %s3303_s16 }
  0x1e   : > { %s305_s19 = sshll.u32 %s295_s18, 4  ;;  %s3326_s1 = sld [smem:[#allocation17_spill]]  ;;  %s2669_s19 = int_to_ptr.vmem [resolvable:$true] %s305_s19 }
  0x1f   : > { %s2671_s7 = scalar_lea.sflag [#allocation6], %s291_s15  ;;  %p2677_p2 = pneg %p2653_p0 }
  0x24   : > { %s2667_s30 = scalar_lea.hbm %s3326_s1, %s3304_s17  ;;  %s2363_s28 = scalar_lea.hbm %s3326_s1, 2048 }
  0x25   : > { %s2358_s8 = scalar_lea.hbm %s2667_s30, 1024  ;;  %p2364_p5 = scmp.lt.u32.totalorder %s2667_s30, %s3326_s1 }
  0x26   : > { %p2359_p1 = scmp.ne.s32.totalorder %s2667_s30, %s2358_s8  ;;  %p2365_p6 = scmp.lt.u32.totalorder %s2363_s28, %s2358_s8 }
  0x27   : > { %p2367_p10 = scmp.lt.u32.totalorder %s2358_s8, %s2667_s30 }
  0x28   : > { %p2361_p3 = pnand %p2677_p2, %p2359_p1  ;;  %p2366_p7 = por %p2365_p6, %p2364_p5 }
  0x2a   : > { %p2362_p4 = pneg %p2361_p3  ;;  %p2368_p13 = por %p2367_p10, %p2366_p7 }
  0x2c   : > { %p2369_p12 = pnand %p2368_p13, %p2362_p4 }
  0x2e   : > { %2372 = shalt.err (!%p2369_p12)
}
  0x2f   : > { %s2373_s15 = scalar_lea.vmem %s2669_s19, 1024  ;;  %s2536_s18 = smov [#allocation5]  }
  0x30   : > { %p2374_p1 = scmp.ne.s32.totalorder %s2669_s19, %s2373_s15  ;;  %s2378_s20 = sshll.u32 %s2536_s18, 4  ;;  %s2379_s20 = int_to_ptr.vmem [resolvable:$false] %s2378_s20 }
  0x31   : > { %s2380_s29 = scalar_lea.vmem %s2379_s20, 2048  ;;  %p2381_p9 = scmp.lt.s32.totalorder %s2669_s19, %s2379_s20 }
  0x32   : > { %p2376_p3 = pnand %p2374_p1, %p2677_p2  ;;  %p2382_p8 = scmp.lt.s32.totalorder %s2380_s29, %s2373_s15 }
  0x34   : > { %p2377_p11 = pneg %p2376_p3  ;;  %p2383_p5 = por %p2382_p8, %p2381_p9 }
  0x36   : > { %p2384_p6 = pnand %p2383_p5, %p2377_p11 }
  0x38   : > { %2387 = shalt.err (!%p2384_p6)
}
  0x39   : > { %s3312_s17 = smov 128   ;;  %s2538_s8 = smov 8  }
  0x3a   : > { %2231 = dma.hbm_to_vmem [thread:$0]  (!%p2653_p0), %s2667_s30, 1024, %s2669_s19, %s2671_s7, %s3312_s17, %s3312_s17, %s2538_s8  }
  0x3b   : > { %s3328_s28 = sshll.u32 %s2530_s25, 10  ;;  %p1988_p8 = scmp.ge.s32.totalorder %s2534_s26, 1 }
  0x3c   : > { %s2709_s20 = scalar_lea.hbm %s3298_s2, %s3328_s28  ;;  %s3329_s29 = sshll.u32 %s2649_s13, 6 }
  0x3d   : > { %s319_s1 = scalar_lea.vmem [#allocation7], %s3329_s29  ;;  %p360_p9 = scmp.lt.s32.totalorder %s2534_s26, 3 }
  0x3e   : > { %s329_s11 = sshll.u32 %s319_s1, 4  ;;  %s1979_s12 = sshll.u32 %s2649_s13, 7  ;;  %s2726_s11 = int_to_ptr.vmem [resolvable:$true] %s329_s11 }
  0x3f   : > { %p2715_p11 = pnand %p1988_p8, %p360_p9  ;;  %s2043_s21 = sshll.u32 %s2530_s25, 11 }
  0x40   : > { %s2724_s30 = scalar_lea.hbm %s3296_s0, %s2043_s21  ;;  %s269_s28 = scalar_lea.vmem [#allocation2], %s1979_s12 }
  0x41   : > { %s3330_s23 = scalar_select %p2715_p11, 1, 0 }
  0x42   : > { %s281_s1 = sshll.u32 %s269_s28, 4  ;;  %s266_s15 = scalar_lea.sflag [#allocation3], %s2649_s13  ;;  %s2728_s1 = int_to_ptr.vmem [resolvable:$true] %s281_s1 }
  0x43   : > { %s2388_s18 = scalar_lea.hbm %s2724_s30, 2048  ;;  %s2393_s21 = scalar_lea.hbm %s3296_s0, 4096 }
  0x44   : > { %p2389_p12 = scmp.ne.s32.totalorder %s2724_s30, %s2388_s18  ;;  %p2394_p10 = scmp.lt.u32.totalorder %s2724_s30, %s3296_s0 }
  0x45   : > { %p2395_p13 = scmp.lt.u32.totalorder %s2393_s21, %s2388_s18  ;;  %p2397_p3 = scmp.lt.u32.totalorder %s2388_s18, %s2724_s30 }
  0x46   : > { %p2391_p4 = pnand %p2389_p12, %p2677_p2 }
  0x47   : > { %p2396_p1 = por %p2395_p13, %p2394_p10 }
  0x48   : > { %p2392_p7 = pneg %p2391_p4 }
  0x49   : > { %p2398_p5 = por %p2397_p3, %p2396_p1 }
  0x4b   : > { %p2399_p6 = pnand %p2398_p5, %p2392_p7 }
  0x4d   : > { %2402 = shalt.err (!%p2399_p6)
}
  0x4e   : > { %s2403_s12 = scalar_lea.vmem %s2728_s1, 2048  ;;  %s2539_s28 = smov [#allocation2]  }
  0x4f   : > { %p2404_p8 = scmp.ne.s32.totalorder %s2728_s1, %s2403_s12  ;;  %s2408_s29 = sshll.u32 %s2539_s28, 4  ;;  %s2409_s29 = int_to_ptr.vmem [resolvable:$false] %s2408_s29 }
  0x50   : > { %s2410_s17 = scalar_lea.vmem %s2409_s29, 4096  ;;  %p2411_p4 = scmp.lt.s32.totalorder %s2728_s1, %s2409_s29 }
  0x51   : > { %p2406_p9 = pnand %p2404_p8, %p2677_p2  ;;  %p2412_p11 = scmp.lt.s32.totalorder %s2410_s17, %s2403_s12 }
  0x53   : > { %p2407_p12 = pneg %p2406_p9  ;;  %p2413_p10 = por %p2412_p11, %p2411_p4 }
  0x55   : > { %p2414_p13 = pnand %p2413_p10, %p2407_p12 }
  0x57   : > { %2417 = shalt.err (!%p2414_p13)
}
  0x58   : > { %s3331_s18 = smov 128   ;;  %s2418_s5 = scalar_lea.hbm %s2709_s20, 1024 }
  0x59   : > { %2228 = dma.hbm_to_vmem [thread:$0]  (!%p2653_p0), %s2724_s30, 2048, %s2728_s1, %s266_s15, %s3331_s18, %s3331_s18, %s2538_s8  }
  0x5a   : > { %p2419_p7 = scmp.ne.s32.totalorder %s2709_s20, %s2418_s5  ;;  %s2423_s12 = scalar_lea.hbm %s3298_s2, 2048 }
  0x5b   : > { %p2424_p3 = scmp.lt.u32.totalorder %s2709_s20, %s3298_s2  ;;  %p2425_p5 = scmp.lt.u32.totalorder %s2423_s12, %s2418_s5 }
  0x5c   : > { %p2421_p11 = pnand %p2419_p7, %p2677_p2  ;;  %p2427_p8 = scmp.lt.u32.totalorder %s2418_s5, %s2709_s20 }
  0x5d   : > { %p2426_p6 = por %p2425_p5, %p2424_p3 }
  0x5e   : > { %p2422_p1 = pneg %p2421_p11 }
  0x5f   : > { %p2428_p9 = por %p2427_p8, %p2426_p6 }
  0x61   : > { %p2429_p12 = pnand %p2428_p9, %p2422_p1 }
  0x63   : > { %2432 = shalt.err (!%p2429_p12)
}
  0x64   : > { %s2433_s13 = scalar_lea.vmem %s2726_s11, 1024  ;;  %s2540_s30 = smov [#allocation7]  }
  0x65   : > { %p2434_p4 = scmp.ne.s32.totalorder %s2726_s11, %s2433_s13  ;;  %s2438_s1 = sshll.u32 %s2540_s30, 4  ;;  %s2439_s1 = int_to_ptr.vmem [resolvable:$false] %s2438_s1 }
  0x66   : > { %s2440_s15 = scalar_lea.vmem %s2439_s1, 2048  ;;  %p2441_p7 = scmp.lt.s32.totalorder %s2726_s11, %s2439_s1 }
  0x67   : > { %p2436_p10 = pnand %p2434_p4, %p2677_p2  ;;  %p2442_p11 = scmp.lt.s32.totalorder %s2440_s15, %s2433_s13 }
  0x69   : > { %p2437_p13 = pneg %p2436_p10  ;;  %p2443_p3 = por %p2442_p11, %p2441_p7 }
  0x6b   : > { %p2444_p5 = pnand %p2443_p3, %p2437_p13 }
  0x6d   : > { %2447 = shalt.err (!%p2444_p5)
}
  0x6e   : > { %2234 = dma.hbm_to_vmem [thread:$0]  (!%p2653_p0), %s2709_s20, 1024, %s2726_s11, %s2671_s7, %s3331_s18, %s3331_s18, %s2538_s8  }
  0x6f   : > { %p3332_p2 = scmp.ne.s32.totalorder %s3330_s23, 0 }
  0x70   : > { %s2785_s16 = sand.u32 (!%p3332_p2), 1, %s2518_s22   ;;  %p3333_p1 = scmp.ne.s32.totalorder (!%p3332_p2), %s3320_s9, 0 }
  0x71   : > { %364 = sbr.rel (%p3332_p2) target bundleno = 936 (0x3a8), region = 40  ;;  %s1989_s17 = sshll.u32 (!%p3332_p2), %s2785_s16, 7 }
  0x72   : > { %s367_s5 = scalar_lea.sflag (!%p3332_p2), [#allocation3], %s2785_s16  ;;  %s2791_s14 = scalar_lea.vmem (!%p3332_p2), [#allocation2], %s1989_s17 }
  0x78   : > { %2501 = dma.done.wait (%p3333_p1), %s367_s5, 2048  }
  0x79   : > { %2503 = vsyncadd (%p3333_p1), %s367_s5, 4294965248  ;;  %s375_s23 = sand.u32 1, %s2611_s27   ;;  %s1990_s11 = sshll.u32 %s2785_s16, 6 }
  0x7a   : > { %s376_s7 = scalar_lea.sflag [#allocation6], %s375_s23  ;;  %s379_s8 = scalar_lea.vmem [#allocation5], %s1990_s11 }
  0x7b   : > { %2505 = dma.done.wait (%p3333_p1), %s376_s7, 2048  }
  0x7c   : > { %2507 = vsyncadd (%p3333_p1), %s376_s7, 4294965248  ;;  %vm550_vm0 = vcmask 261120   ;;  %v530_v1 = vld [vmem:[%s379_s8] sm:$0xff]  ;;  %v531_v2 = vld [vmem:[%s379_s8 + $0x8] sm:$0xff]  ;;  %p462_p0 = scmp.lt.s32.totalorder %s2526_s24, 1  ;;  %v2541_v46 = vmov 0  }
  0x7d   : > { %vm2807_vm1 = vmpackc.low %vm550_vm0, %vm550_vm0  ;;  %v532_v3 = vld [vmem:[%s379_s8 + $0x10] sm:$0xff]  ;;  %v2177_v4 = vpack.c.bf16 %v531_v2, %v530_v1  ;;  %v533_v5 = vld [vmem:[%s379_s8 + $0x18] sm:$0xff]  ;;  %vm1018_vm8 = vcmask 130048   ;;  %s388_s13 = scalar_lea.vmem [#allocation7], %s1990_s11  ;;  %p3345_p8 = scmp.ne.s32.totalorder %s3321_s10, 0 }
  0x7e   : > { %v498_v6 = vld [vmem:[%s2791_s14] sm:$0xff]  ;;  %v2183_v7 = vpack.c.bf16 %v533_v5, %v532_v3  ;;  %v499_v11 = vld [vmem:[%s2791_s14 + $0x8] sm:$0xff]  ;;  %v536_v13 = vld [vmem:[%s379_s8 + $0x30] sm:$0xff]  ;;  %s2861_s27 = scalar_select %p462_p0, %s2526_s24, 1 }
  0x7f   : > { %v514_v8 = vmul.f32 0.17677669, %v498_v6  ;;  %v502_v9 = vld [vmem:[%s2791_s14 + $0x20] sm:$0xff]  ;;  %2179 = vmatprep.subr.msk.bf16.mxu0 %vm2807_vm1, %v2177_v4  ;;  %v503_v12 = vld [vmem:[%s2791_s14 + $0x28] sm:$0xff]  ;;  %v500_v14 = vld [vmem:[%s2791_s14 + $0x10] sm:$0xff]  ;;  %s2542_s20 = smov [#allocation8]  }
  0x80   : > { %v518_v10 = vmul.f32 0.17677669, %v502_v9  ;;  %2182 = vmatpush3.bf16.xpose.msk.msra.mxu0 %vm2807_vm1, %v2177_v4  ;;  %2185 = vmatprep.subr.msk.bf16.mxu1 %vm2807_vm1, %v2183_v7  ;;  %v537_v15 = vld [vmem:[%s379_s8 + $0x38] sm:$0xff]  ;;  %v534_v16 = vld [vmem:[%s379_s8 + $0x20] sm:$0xff]  ;;  %v504_v17 = vld [vmem:[%s2791_s14 + $0x30] sm:$0xff]  ;;  %s1995_s9 = sshll.u32 %s2861_s27, 3 }
  0x81   : > { %2188 = vmatpush3.bf16.xpose.msk.msra.mxu1 %vm2807_vm1, %v2183_v7  ;;  %2101 = vmatprep.mubr.msk.f32.mxu0 %vm550_vm0, %v514_v8  ;;  %v2195_v18 = vpack.c.bf16 %v537_v15, %v536_v13  ;;  %v535_v19 = vld [vmem:[%s379_s8 + $0x28] sm:$0xff]  ;;  %v515_v20 = vmul.f32 0.17677669, %v499_v11  ;;  %v519_v22 = vmul.f32 0.17677669, %v503_v12  ;;  %v501_v24 = vld [vmem:[%s2791_s14 + $0x18] sm:$0xff]  ;;  %s477_s21 = scalar_lea.vmem %s3300_s4, %s1995_s9 }
  0x82   : > { %2111 = vmatprep.mubr.msk.f32.mxu1 %vm550_vm0, %v518_v10  ;;  %v2189_v21 = vpack.c.bf16 %v535_v19, %v534_v16  ;;  %v516_v23 = vmul.f32 0.17677669, %v500_v14  ;;  %v520_v25 = vmul.f32 0.17677669, %v504_v17  ;;  %v505_v26 = vld [vmem:[%s2791_s14 + $0x38] sm:$0xff]  ;;  %v506_v27 = vld [vmem:[%s2791_s14 + $0x40] sm:$0xff] }
  0x83   : > { %2197 = vmatprep.subr.msk.bf16.mxu1 %vm2807_vm1, %v2195_v18  ;;  %v510_v28 = vld [vmem:[%s2791_s14 + $0x60] sm:$0xff]  ;;  %v517_v29 = vmul.f32 0.17677669, %v501_v24  ;;  %v521_v30 = vmul.f32 0.17677669, %v505_v26  ;;  %v511_v33 = vld [vmem:[%s2791_s14 + $0x68] sm:$0xff] }
  0x84   : > { %2191 = vmatprep.subr.msk.bf16.mxu0 %vm2807_vm1, %v2189_v21  ;;  %v522_v31 = vmul.f32 0.17677669, %v506_v27  ;;  %v526_v32 = vmul.f32 0.17677669, %v510_v28  ;;  %v507_v34 = vld [vmem:[%s2791_s14 + $0x48] sm:$0xff]  ;;  %v512_v35 = vld [vmem:[%s2791_s14 + $0x70] sm:$0xff] }
  0x85   : > { %v508_v36 = vld [vmem:[%s2791_s14 + $0x50] sm:$0xff]  ;;  %v527_v37 = vmul.f32 0.17677669, %v511_v33  ;;  %v523_v38 = vmul.f32 0.17677669, %v507_v34  ;;  %v513_v40 = vld [vmem:[%s2791_s14 + $0x78] sm:$0xff] }
  0x86   : > { %v528_v39 = vmul.f32 0.17677669, %v512_v35  ;;  %v524_v41 = vmul.f32 0.17677669, %v508_v36  ;;  %v509_v42 = vld [vmem:[%s2791_s14 + $0x58] sm:$0xff]  ;;  %v963_v45 = vld [vmem:[%s477_s21] sm:$0xff] }
  0x87   : > { %2102 = vmatmul.mubr.msk.f32.vlgmr.msra.gmra.mrb[0].mxu0 %vm550_vm0, %v515_v20  ;;  %v529_v43 = vmul.f32 0.17677669, %v513_v40  ;;  %v525_v44 = vmul.f32 0.17677669, %v509_v42  ;;  %vm964_vm2 = vnez %v963_v45  ;;  %s2046_s19 = sshll.u32 %s2861_s27, 5  ;;  %s2047_s30 = sshll.u32 %s2861_s27, 7 }
  0x88   : > { %2112 = vmatmul.mubr.msk.f32.vlgmr.msra.gmra.mrb[0].mxu1 %vm550_vm0, %v519_v22  ;;  %2104 = vmatprep.mubr.msk.f32.mxu0 %vm550_vm0, %v516_v23  ;;  %v965_v47 = vsel %vm964_vm2, 16843009, %v2541_v46  ;;  %s469_s29 = scalar_lea.vmem %s3299_s3, %s2046_s19  ;;  %s3099_s5 = scalar_lea.vmem %s3302_s6, %s2047_s30 }
  0x89   : > { %2114 = vmatprep.mubr.msk.f32.mxu1 %vm550_vm0, %v520_v25  ;;  %2200 = vmatpush3.bf16.xpose.msk.msra.mxu1 %vm2807_vm1, %v2195_v18  ;;  %v967_v48 = vunpack.c.1.s8 %v965_v47  ;;  %v966_v49 = vunpack.c.0.s8 %v965_v47  ;;  %v969_v52 = vunpack.c.3.s8 %v965_v47  ;;  %v968_v54 = vunpack.c.2.s8 %v965_v47  ;;  %v547_v0 = vld [vmem:[%s469_s29 + $0x8] sm:$0xff]  ;;  %v546_v2 = vld [vmem:[%s469_s29] sm:$0xff]  ;;  %v2879_v14 = vld [vmem:[%s469_s29 + $0x18] sm:$0xff]  ;;  %s3206_s14 = scalar_lea.vmem [#allocation8], %s1989_s17  ;;  %s2048_s17 = sshll.u32 %s2526_s24, 11 }
  0x8a   : > { %2194 = vmatpush3.bf16.xpose.msk.msra.mxu0 %vm2807_vm1, %v2189_v21  ;;  %v548_v17 = vld [vmem:[%s469_s29 + $0x10] sm:$0xff]  ;;  %s1744_s23 = sshll.u32 %s3206_s14, 4  ;;  %s3344_s8 = sld [smem:[#allocation18_spill]]  ;;  %s3243_s23 = int_to_ptr.vmem [resolvable:$true] %s1744_s23 }
  0x8b   : > { %2105 = vmatmul.mubr.msk.f32.gmra.mrb[2].mxu0 %vm550_vm0, %v517_v29  ;;  %v972_v50 = vpack.c.b16 %v967_v48, %v967_v48  ;;  %v970_v51 = vpack.c.b16 %v966_v49, %v966_v49  ;;  %v976_v56 = vpack.c.b16 %v969_v52, %v969_v52  ;;  %v974_v57 = vpack.c.b16 %v968_v54, %v968_v54  ;;  %s1712_s24 = scalar_lea.sflag [#allocation4], %s2785_s16  ;;  %s2448_s9 = scalar_lea.vmem %s3243_s23, 2048 }
  0x8c   : > { %2115 = vmatmul.mubr.msk.f32.gmra.mrb[2].mxu1 %vm550_vm0, %v521_v30  ;;  %2121 = vmatprep.mubr.msk.f32.mxu0 %vm550_vm0, %v522_v31  ;;  %p2449_p6 = scmp.ne.s32.totalorder %s3243_s23, %s2448_s9  ;;  %s2452_s18 = sshll.u32 %s2542_s20, 4  ;;  %s2453_s18 = int_to_ptr.vmem [resolvable:$false] %s2452_s18 }
  0x8d   : > { %2131 = vmatprep.mubr.msk.f32.mxu1 %vm550_vm0, %v526_v32  ;;  %v973_v53 = vpack.c.b8 %v972_v50, %v972_v50  ;;  %v971_v55 = vpack.c.b8 %v970_v51, %v970_v51  ;;  %v977_v58 = vpack.c.b8 %v976_v56, %v976_v56  ;;  %v975_v61 = vpack.c.b8 %v974_v57, %v974_v57  ;;  %s2454_s21 = scalar_lea.vmem %s2453_s18, 4096  ;;  %p2455_p4 = scmp.lt.s32.totalorder %s3243_s23, %s2453_s18 }
  0x8e   : > { %p2450_p9 = pnand %p2449_p6, %p3345_p8  ;;  %p2456_p10 = scmp.lt.s32.totalorder %s2454_s21, %s2448_s9 }
  0x8f   : > { %vm979_vm3 = vnez %v973_v53  ;;  %vm978_vm4 = vnez %v971_v55  ;;  %vm981_vm5 = vnez %v977_v58  ;;  %vm980_vm6 = vnez %v975_v61 }
  0x90   : > { %2132 = vmatmul.mubr.msk.f32.vlgmr.msra.gmra.mrb[4].mxu1 %vm550_vm0, %v527_v37  ;;  %v983_v59 = vsel %vm979_vm3, 16843009, %v2541_v46  ;;  %v982_v60 = vsel %vm978_vm4, 16843009, %v2541_v46  ;;  %v985_v1 = vsel %vm981_vm5, 16843009, %v2541_v46  ;;  %s3241_s27 = scalar_lea.hbm %s3344_s8, %s2048_s17  ;;  %p2451_p12 = pneg %p2450_p9 }
  0x91   : > { %2122 = vmatmul.mubr.msk.f32.vlgmr.msra.gmra.mrb[4].mxu0 %vm550_vm0, %v523_v38  ;;  %2134 = vmatprep.mubr.msk.f32.mxu1 %vm550_vm0, %v528_v39  ;;  %v987_v62 = vunpack.c.0.s8 %v983_v59  ;;  %v986_v63 = vunpack.c.0.s8 %v982_v60  ;;  %v989_v9 = vunpack.c.0.s8 %v985_v1  ;;  %v984_v10 = vsel %vm980_vm6, 16843009, %v2541_v46  ;;  %p2457_p13 = por %p2456_p10, %p2455_p4 }
  0x92   : > { %2124 = vmatprep.mubr.msk.f32.mxu0 %vm550_vm0, %v524_v41  ;;  %v988_v22 = vunpack.c.0.s8 %v984_v10 }
  0x93   : > { %vm2871_vm7 = vcmp.ne.s32.totalorder %v987_v62, 0  ;;  %vm2875_vm9 = vcmp.ne.s32.totalorder %v986_v63, 0  ;;  %vm2902_vm10 = vcmp.ne.s32.totalorder %v989_v9, 0  ;;  %p2458_p7 = pnand %p2457_p13, %p2451_p12 }
  0x94   : > { %2135 = vmatmul.mubr.msk.f32.gmra.mrb[6].mxu1 %vm550_vm0, %v529_v43  ;;  %vm2919_vm11 = vcmp.ne.s32.totalorder %v988_v22, 0 }
  0x95   : > { %2125 = vmatmul.mubr.msk.f32.gmra.mrb[6].mxu0 %vm550_vm0, %v525_v44 }
 0x15a   : > { %v2103_v3 = vpop.f32.mrb[0].mxu0 }
 0x15b   : > { %v641_v5 = vadd.f32 %v2103_v3, %v547_v0  ;;  %v635_v6 = vpop.f32.mrb[1].mxu0  ;;  %v2113_v7 = vpop.f32.mrb[0].mxu1 }
 0x15c   : > { %v636_v11 = vadd.f32 %v635_v6, %v546_v2  ;;  %v744_v12 = vadd.f32 %v2113_v7, %v547_v0  ;;  %v738_v13 = vpop.f32.mrb[1].mxu1 }
 0x15d   : > { %v739_v15 = vadd.f32 %v738_v13, %v546_v2  ;;  %v2883_v16 = vsel %vm2871_vm7, -1e-09, %v641_v5 }
 0x15e   : > { %v1022_v18 = vsel %vm1018_vm8, %v2883_v16, -inf  ;;  %v2889_v19 = vsel %vm2875_vm9, -1e-09, %v636_v11  ;;  %v2893_v20 = vsel %vm2871_vm7, -1e-09, %v744_v12  ;;  %v2106_v21 = vpop.f32.mrb[2].mxu0 }
 0x15f   : > { %1023 = vmax.xlane.f32.xlu1 %v1022_v18  ;;  %v1019_v23 = vsel %vm1018_vm8, %v2889_v19, -inf  ;;  %v2116_v24 = vpop.f32.mrb[2].mxu1  ;;  %v651_v25 = vadd.f32 %v2106_v21, %v2879_v14  ;;  %v2900_v26 = vsel %vm2875_vm9, -1e-09, %v739_v15  ;;  %v645_v27 = vpop.f32.mrb[3].mxu0  ;;  %v1034_v30 = vsel %vm1018_vm8, %v2893_v20, -inf }
 0x160   : > { %1020 = vmax.xlane.f32.xlu0 %v1019_v23  ;;  %v754_v29 = vadd.f32 %v2116_v24, %v2879_v14  ;;  %v748_v31 = vpop.f32.mrb[3].mxu1  ;;  %v1031_v32 = vsel %vm1018_vm8, %v2900_v26, -inf  ;;  %v646_v34 = vadd.f32 %v645_v27, %v548_v17 }
 0x161   : > { %v749_v33 = vadd.f32 %v748_v31, %v548_v17  ;;  %v2917_v36 = vsel %vm2902_vm10, -1e-09, %v651_v25 }
 0x162   : > { %v2913_v35 = vsel %vm2902_vm10, -1e-09, %v754_v29  ;;  %v1028_v42 = vsel %vm1018_vm8, %v2917_v36, -inf  ;;  %v2933_v47 = vsel %vm2919_vm11, -1e-09, %v646_v34 }
 0x163   : > { %1035 = vmax.xlane.f32.xlu1 %v1034_v30  ;;  %v2133_v38 = vpop.f32.mrb[4].mxu1  ;;  %v1040_v39 = vsel %vm1018_vm8, %v2913_v35, -inf  ;;  %v2929_v44 = vsel %vm2919_vm11, -1e-09, %v749_v33  ;;  %v1025_v52 = vsel %vm1018_vm8, %v2933_v47, -inf }
 0x164   : > { %1032 = vmax.xlane.f32.xlu0 %v1031_v32  ;;  %v2123_v40 = vpop.f32.mrb[4].mxu0  ;;  %v944_v41 = vpop.f32.mrb[5].mxu1  ;;  %v950_v43 = vadd.f32 %v2133_v38, %v547_v0  ;;  %v1037_v49 = vsel %vm1018_vm8, %v2929_v44, -inf }
 0x165   : > { %v841_v45 = vpop.f32.mrb[5].mxu0  ;;  %v847_v46 = vadd.f32 %v2123_v40, %v547_v0  ;;  %v945_v53 = vadd.f32 %v944_v41, %v546_v2 }
 0x166   : > { %v2941_v54 = vsel %vm2871_vm7, -1e-09, %v950_v43  ;;  %v842_v56 = vadd.f32 %v841_v45, %v546_v2 }
 0x167   : > { %1041 = vmax.xlane.f32.xlu1 %v1040_v39  ;;  %v2136_v48 = vpop.f32.mrb[6].mxu1  ;;  %v2945_v57 = vsel %vm2871_vm7, -1e-09, %v847_v46  ;;  %v1058_v58 = vsel %vm1018_vm8, %v2941_v54, -inf  ;;  %v2953_v61 = vsel %vm2875_vm9, -1e-09, %v945_v53 }
 0x168   : > { %1029 = vmax.xlane.f32.xlu0 %v1028_v42  ;;  %v2126_v50 = vpop.f32.mrb[6].mxu0  ;;  %v954_v51 = vpop.f32.mrb[7].mxu1  ;;  %v1046_v59 = vsel %vm1018_vm8, %v2945_v57, -inf  ;;  %v2957_v63 = vsel %vm2875_vm9, -1e-09, %v842_v56  ;;  %v1055_v0 = vsel %vm1018_vm8, %v2953_v61, -inf  ;;  %v960_v1 = vadd.f32 %v2136_v48, %v2879_v14 }
 0x169   : > { %v851_v55 = vpop.f32.mrb[7].mxu0  ;;  %v955_v60 = vadd.f32 %v954_v51, %v548_v17  ;;  %v1043_v2 = vsel %vm1018_vm8, %v2957_v63, -inf  ;;  %v857_v5 = vadd.f32 %v2126_v50, %v2879_v14 }
 0x16a   : > { %v852_v62 = vadd.f32 %v851_v55, %v548_v17  ;;  %v2979_v8 = vsel %vm2902_vm10, -1e-09, %v960_v1 }
 0x16b   : > { %1038 = vmax.xlane.f32.xlu1 %v1037_v49  ;;  %v2966_v3 = vsel %vm2919_vm11, -1e-09, %v955_v60  ;;  %v1064_v9 = vsel %vm1018_vm8, %v2979_v8, -inf  ;;  %v2985_v10 = vsel %vm2902_vm10, -1e-09, %v857_v5 }
 0x16c   : > { %1026 = vmax.xlane.f32.xlu0 %v1025_v52  ;;  %v2970_v4 = vsel %vm2919_vm11, -1e-09, %v852_v62  ;;  %v1061_v6 = vsel %vm1018_vm8, %v2966_v3, -inf  ;;  %v1052_v11 = vsel %vm1018_vm8, %v2985_v10, -inf }
 0x16d   : > { %v1049_v7 = vsel %vm1018_vm8, %v2970_v4, -inf }
 0x16f   : > { %1059 = vmax.xlane.f32.xlu1 %v1058_v58 }
 0x170   : > { %1047 = vmax.xlane.f32.xlu0 %v1046_v59 }
 0x173   : > { %1056 = vmax.xlane.f32.xlu1 %v1055_v0 }
 0x174   : > { %1044 = vmax.xlane.f32.xlu0 %v1043_v2 }
 0x177   : > { %1062 = vmax.xlane.f32.xlu1 %v1061_v6 }
 0x178   : > { %1050 = vmax.xlane.f32.xlu0 %v1049_v7 }
 0x17b   : > { %1065 = vmax.xlane.f32.xlu1 %v1064_v9 }
 0x17c   : > { %1053 = vmax.xlane.f32.xlu0 %v1052_v11 }
 0x1ec   : > { %v1024_v12 = vpop.xlane.xlu1 %1023 }
 0x1ed   : > { %v1068_v13 = vsub.f32 %v2883_v16, %v1024_v12  ;;  %v1021_v14 = vpop.xlane.xlu0 %1020 }
 0x1ee   : > { %v1067_v15 = vsub.f32 %v2889_v19, %v1021_v14 }
 0x1ef   : > { %v1085_v17 = vmul.f32 1.442695, %v1068_v13 }
 0x1f0   : > { %v1083_v18 = vmul.f32 1.442695, %v1067_v15  ;;  %v1036_v21 = vpop.xlane.xlu1 %1035 }
 0x1f1   : > { %2294 = vpow2.f32 %v1085_v17  ;;  %v1072_v22 = vsub.f32 %v2893_v20, %v1036_v21  ;;  %v1033_v23 = vpop.xlane.xlu0 %1032 }
 0x1f2   : > { %v1071_v24 = vsub.f32 %v2900_v26, %v1033_v23  ;;  %2296 = vpow2.f32 %v1083_v18 }
 0x1f3   : > { %v1093_v25 = vmul.f32 1.442695, %v1072_v22 }
 0x1f4   : > { %v1091_v27 = vmul.f32 1.442695, %v1071_v24  ;;  %v1042_v28 = vpop.xlane.xlu1 %1041 }
 0x1f5   : > { %2298 = vpow2.f32 %v1093_v25  ;;  %v1074_v29 = vsub.f32 %v2913_v35, %v1042_v28  ;;  %v1030_v16 = vpop.xlane.xlu0 %1029 }
 0x1f6   : > { %v1070_v30 = vsub.f32 %v2917_v36, %v1030_v16  ;;  %2300 = vpow2.f32 %v1091_v27 }
 0x1f7   : > { %v1097_v19 = vmul.f32 1.442695, %v1074_v29 }
 0x1f8   : > { %v1089_v31 = vmul.f32 1.442695, %v1070_v30  ;;  %v1039_v32 = vpop.xlane.xlu1 %1038 }
 0x1f9   : > { %v1073_v33 = vsub.f32 %v2929_v44, %v1039_v32  ;;  %v1027_v20 = vpop.xlane.xlu0 %1026 }
 0x1fa   : > { %2302 = vpow2.f32 %v1089_v31  ;;  %v1069_v26 = vsub.f32 %v2933_v47, %v1027_v20  ;;  %v539_v31 = vld [vmem:[%s388_s13 + $0x8] sm:$0xff]  ;;  %v541_v20 = vld [vmem:[%s388_s13 + $0x18] sm:$0xff] }
 0x1fb   : > { %v2997_v34 = vpop.eup %2294  ;;  %2304 = vpow2.f32 %v1097_v19  ;;  %v1095_v37 = vmul.f32 1.442695, %v1073_v33  ;;  %v538_v19 = vld [vmem:[%s388_s13] sm:$0xff]  ;;  %v540_v33 = vld [vmem:[%s388_s13 + $0x10] sm:$0xff] }
 0x1fc   : > { %v1087_v38 = vmul.f32 1.442695, %v1069_v26  ;;  %v1060_v39 = vpop.xlane.xlu1 %1059  ;;  %v1118_v35 = vsel %vm1018_vm8, %v2997_v34, 0.0  ;;  %v3001_v36 = vpop.eup %2296  ;;  %v2201_v32 = vpack.c.bf16 %v539_v31, %v538_v19  ;;  %v2205_v26 = vpack.c.bf16 %v541_v20, %v540_v33 }
 0x1fd   : > { %v1080_v40 = vsub.f32 %v2941_v54, %v1060_v39  ;;  %1119 = vadd.xlane.f32.xlu0 %v1118_v35  ;;  %v1048_v41 = vpop.xlane.xlu0 %1047  ;;  %v1115_v48 = vsel %vm1018_vm8, %v3001_v36, 0.0  ;;  %v544_v35 = vld [vmem:[%s388_s13 + $0x30] sm:$0xff] }
 0x1fe   : > { %2306 = vpow2.f32 %v1087_v38  ;;  %v1076_v42 = vsub.f32 %v2945_v57, %v1048_v41  ;;  %2202 = vmatprep.subr.bf16.mxu0 %v2201_v32  ;;  %2206 = vmatprep.subr.bf16.mxu1 %v2205_v26  ;;  %v543_v38 = vld [vmem:[%s388_s13 + $0x28] sm:$0xff] }
 0x1ff   : > { %v3005_v43 = vpop.eup %2298  ;;  %2308 = vpow2.f32 %v1095_v37  ;;  %v1109_v44 = vmul.f32 1.442695, %v1080_v40  ;;  %2204 = vmatpush3.bf16.msra.mxu0 %v2201_v32  ;;  %2208 = vmatpush3.bf16.msra.mxu1 %v2205_v26  ;;  %v542_v37 = vld [vmem:[%s388_s13 + $0x20] sm:$0xff]  ;;  %v545_v40 = vld [vmem:[%s388_s13 + $0x38] sm:$0xff] }
 0x200   : > { %v1101_v45 = vmul.f32 1.442695, %v1076_v42  ;;  %v1057_v46 = vpop.xlane.xlu1 %1056  ;;  %v1130_v47 = vsel %vm1018_vm8, %v3005_v43, 0.0  ;;  %v3011_v49 = vpop.eup %2300  ;;  %v3071_v39 = vpack.c.bf16 %v543_v38, %v542_v37  ;;  %v3074_v41 = vpack.c.bf16 %v545_v40, %v544_v35 }
 0x201   : > { %v1079_v50 = vsub.f32 %v2953_v61, %v1057_v46  ;;  %1131 = vadd.xlane.f32.xlu1 %v1130_v47  ;;  %1116 = vadd.xlane.f32.xlu0 %v1115_v48  ;;  %v1045_v51 = vpop.xlane.xlu0 %1044  ;;  %v1127_v57 = vsel %vm1018_vm8, %v3011_v49, 0.0 }
 0x202   : > { %2310 = vpow2.f32 %v1101_v45  ;;  %v1075_v52 = vsub.f32 %v2957_v63, %v1045_v51  ;;  %2210 = vmatprep.subr.bf16.mxu0 %v3071_v39  ;;  %2214 = vmatprep.subr.bf16.mxu1 %v3074_v41 }
 0x203   : > { %2312 = vpow2.f32 %v1109_v44  ;;  %v1107_v53 = vmul.f32 1.442695, %v1079_v50 }
 0x204   : > { %v3015_v54 = vpop.eup %2302  ;;  %v1099_v55 = vmul.f32 1.442695, %v1075_v52  ;;  %v1063_v56 = vpop.xlane.xlu1 %1062 }
 0x205   : > { %v3019_v58 = vpop.eup %2304  ;;  %v1081_v59 = vsub.f32 %v2966_v3, %v1063_v56  ;;  %1128 = vadd.xlane.f32.xlu1 %v1127_v57  ;;  %v1051_v60 = vpop.xlane.xlu0 %1050  ;;  %v1124_v61 = vsel %vm1018_vm8, %v3015_v54, 0.0 }
 0x206   : > { %2314 = vpow2.f32 %v1099_v55  ;;  %v1077_v62 = vsub.f32 %v2970_v4, %v1051_v60  ;;  %1125 = vadd.xlane.f32.xlu0 %v1124_v61  ;;  %v1136_v5 = vsel %vm1018_vm8, %v3019_v58, 0.0 }
 0x207   : > { %2316 = vpow2.f32 %v1107_v53  ;;  %v1111_v63 = vmul.f32 1.442695, %v1081_v59 }
 0x208   : > { %v3025_v0 = vpop.eup %2306  ;;  %v1103_v1 = vmul.f32 1.442695, %v1077_v62  ;;  %v1066_v2 = vpop.xlane.xlu1 %1065 }
 0x209   : > { %v3029_v6 = vpop.eup %2308  ;;  %v1082_v3 = vsub.f32 %v2979_v8, %v1066_v2  ;;  %1137 = vadd.xlane.f32.xlu1 %v1136_v5  ;;  %v1054_v7 = vpop.xlane.xlu0 %1053  ;;  %v1121_v9 = vsel %vm1018_vm8, %v3025_v0, 0.0 }
 0x20a   : > { %2318 = vpow2.f32 %v1103_v1  ;;  %v1078_v4 = vsub.f32 %v2985_v10, %v1054_v7  ;;  %1122 = vadd.xlane.f32.xlu0 %v1121_v9  ;;  %v1133_v14 = vsel %vm1018_vm8, %v3029_v6, 0.0 }
 0x20b   : > { %2320 = vpow2.f32 %v1111_v63  ;;  %v1113_v11 = vmul.f32 1.442695, %v1082_v3 }
 0x20c   : > { %v3035_v12 = vpop.eup %2310  ;;  %v1105_v13 = vmul.f32 1.442695, %v1078_v4 }
 0x20d   : > { %v3039_v15 = vpop.eup %2312  ;;  %1134 = vadd.xlane.f32.xlu1 %v1133_v14  ;;  %v1142_v8 = vsel %vm1018_vm8, %v3035_v12, 0.0 }
 0x20e   : > { %2322 = vpow2.f32 %v1105_v13  ;;  %1143 = vadd.xlane.f32.xlu0 %v1142_v8  ;;  %v1154_v10 = vsel %vm1018_vm8, %v3039_v15, 0.0 }
 0x20f   : > { %2324 = vpow2.f32 %v1113_v11 }
 0x210   : > { %v3043_v17 = vpop.eup %2314 }
 0x211   : > { %v3047_v18 = vpop.eup %2316  ;;  %1155 = vadd.xlane.f32.xlu1 %v1154_v10  ;;  %v1139_v21 = vsel %vm1018_vm8, %v3043_v17, 0.0 }
 0x212   : > { %1140 = vadd.xlane.f32.xlu0 %v1139_v21  ;;  %v1151_v23 = vsel %vm1018_vm8, %v3047_v18, 0.0 }
 0x214   : > { %v3051_v22 = vpop.eup %2318 }
 0x215   : > { %v3055_v24 = vpop.eup %2320  ;;  %1152 = vadd.xlane.f32.xlu1 %v1151_v23  ;;  %v1145_v25 = vsel %vm1018_vm8, %v3051_v22, 0.0 }
 0x216   : > { %1146 = vadd.xlane.f32.xlu0 %v1145_v25  ;;  %v1157_v28 = vsel %vm1018_vm8, %v3055_v24, 0.0 }
 0x218   : > { %v3059_v27 = vpop.eup %2322 }
 0x219   : > { %v3063_v29 = vpop.eup %2324  ;;  %1158 = vadd.xlane.f32.xlu1 %v1157_v28  ;;  %v1148_v16 = vsel %vm1018_vm8, %v3059_v27, 0.0 }
 0x21a   : > { %1149 = vadd.xlane.f32.xlu0 %v1148_v16  ;;  %v1160_v30 = vsel %vm1018_vm8, %v3063_v29, 0.0 }
 0x21d   : > { %1161 = vadd.xlane.f32.xlu1 %v1160_v30 }
 0x28a   : > { %v1120_v42 = vpop.xlane.xlu0 %1119 }
 0x28b   : > { %2326 = vrcp.f32 %v1120_v42 }
 0x28e   : > { %v1132_v44 = vpop.xlane.xlu1 %1131  ;;  %v1117_v45 = vpop.xlane.xlu0 %1116 }
 0x28f   : > { %2328 = vrcp.f32 %v1132_v44 }
 0x290   : > { %2330 = vrcp.f32 %v1117_v45 }
 0x292   : > { %v1129_v46 = vpop.xlane.xlu1 %1128 }
 0x293   : > { %2332 = vrcp.f32 %v1129_v46  ;;  %v1126_v47 = vpop.xlane.xlu0 %1125 }
 0x294   : > { %2334 = vrcp.f32 %v1126_v47 }
 0x295   : > { %v2327_v48 = vpop.eup %2326 }
 0x296   : > { %v1180_v50 = vmul.f32 %v2327_v48, %v1120_v42  ;;  %v3077_v51 = vpop.xlane.xlu1 %1137 }
 0x297   : > { %2336 = vrcp.f32 %v3077_v51  ;;  %v3080_v52 = vpop.xlane.xlu0 %1122 }
 0x298   : > { %v1196_v53 = vsub.f32 2.0, %v1180_v50  ;;  %2338 = vrcp.f32 %v3080_v52 }
 0x299   : > { %v2329_v55 = vpop.eup %2328 }
 0x29a   : > { %v2331_v56 = vpop.eup %2330  ;;  %v1212_v57 = vmul.f32 %v2327_v48, %v1196_v53  ;;  %v1184_v59 = vmul.f32 %v2329_v55, %v1132_v44  ;;  %v3083_v60 = vpop.xlane.xlu1 %1134 }
 0x29b   : > { %v1179_v61 = vmul.f32 %v2331_v56, %v1117_v45  ;;  %2340 = vrcp.f32 %v3083_v60  ;;  %v3086_v62 = vpop.xlane.xlu0 %1143 }
 0x29c   : > { %v1228_v63 = vmul.f32 %v1212_v57, %v1120_v42  ;;  %v1200_v1 = vsub.f32 2.0, %v1184_v59  ;;  %2342 = vrcp.f32 %v3086_v62 }
 0x29d   : > { %v2333_v2 = vpop.eup %2332  ;;  %v1195_v5 = vsub.f32 2.0, %v1179_v61 }
 0x29e   : > { %v2335_v3 = vpop.eup %2334  ;;  %v1244_v7 = vsub.f32 2.0, %v1228_v63  ;;  %v1216_v9 = vmul.f32 %v2329_v55, %v1200_v1  ;;  %v1183_v4 = vmul.f32 %v2333_v2, %v1129_v46  ;;  %v3090_v11 = vpop.xlane.xlu1 %1155 }
 0x29f   : > { %v1211_v13 = vmul.f32 %v2331_v56, %v1195_v5  ;;  %v1182_v14 = vmul.f32 %v2335_v3, %v1126_v47  ;;  %2344 = vrcp.f32 %v3090_v11  ;;  %v3093_v8 = vpop.xlane.xlu0 %1140 }
 0x2a0   : > { %v1260_v10 = vmul.f32 %v1244_v7, %v1212_v57  ;;  %v1232_v21 = vmul.f32 %v1216_v9, %v1132_v44  ;;  %v1199_v23 = vsub.f32 2.0, %v1183_v4  ;;  %2346 = vrcp.f32 %v3093_v8 }
 0x2a1   : > { %v2337_v25 = vpop.eup %2336  ;;  %v1227_v28 = vmul.f32 %v1211_v13, %v1117_v45  ;;  %v1198_v16 = vsub.f32 2.0, %v1182_v14 }
 0x2a2   : > { %v2339_v30 = vpop.eup %2338  ;;  %v1276_v19 = vmul.f32 %v2997_v34, %v1260_v10  ;;  %v1248_v31 = vsub.f32 2.0, %v1232_v21  ;;  %v1215_v32 = vmul.f32 %v2333_v2, %v1199_v23  ;;  %v1186_v33 = vmul.f32 %v2337_v25, %v3077_v51  ;;  %v3103_v20 = vpop.xlane.xlu1 %1152 }
 0x2a3   : > { %v1243_v26 = vsub.f32 2.0, %v1227_v28  ;;  %v1214_v37 = vmul.f32 %v2335_v3, %v1198_v16  ;;  %v1181_v38 = vmul.f32 %v2339_v30, %v3080_v52  ;;  %2348 = vrcp.f32 %v3103_v20  ;;  %v3107_v35 = vpop.xlane.xlu0 %1146 }
 0x2a4   : > { %1696 = vst.msk [vmem:[%s3099_s5 + $0x8] sm:$0xff] %vm1018_vm8, %v1276_v19  ;;  %v1264_v40 = vmul.f32 %v1248_v31, %v1216_v9  ;;  %v1231_v42 = vmul.f32 %v1215_v32, %v1129_v46  ;;  %v1202_v44 = vsub.f32 2.0, %v1186_v33  ;;  %2350 = vrcp.f32 %v3107_v35 }
 0x2a5   : > { %v2341_v34 = vpop.eup %2340  ;;  %v1259_v45 = vmul.f32 %v1243_v26, %v1211_v13  ;;  %v1230_v48 = vmul.f32 %v1214_v37, %v1126_v47  ;;  %v1197_v50 = vsub.f32 2.0, %v1181_v38 }
 0x2a6   : > { %v2343_v53 = vpop.eup %2342  ;;  %v1280_v55 = vmul.f32 %v3005_v43, %v1264_v40  ;;  %v1247_v56 = vsub.f32 2.0, %v1231_v42  ;;  %v1218_v57 = vmul.f32 %v2337_v25, %v1202_v44  ;;  %v1185_v59 = vmul.f32 %v2341_v34, %v3083_v60  ;;  %v3114_v61 = vpop.xlane.xlu1 %1158 }
 0x2a7   : > { %v1246_v63 = vsub.f32 2.0, %v1230_v48  ;;  %v1213_v1 = vmul.f32 %v2339_v30, %v1197_v50  ;;  %v1188_v46 = vmul.f32 %v2343_v53, %v3086_v62  ;;  %2352 = vrcp.f32 %v3114_v61  ;;  %v3118_v2 = vpop.xlane.xlu0 %1149 }
 0x2a8   : > { %1700 = vst.msk [vmem:[%s3099_s5 + $0x28] sm:$0xff] %vm1018_vm8, %v1280_v55  ;;  %v1263_v47 = vmul.f32 %v1247_v56, %v1215_v32  ;;  %v1234_v5 = vmul.f32 %v1218_v57, %v3077_v51  ;;  %v1201_v43 = vsub.f32 2.0, %v1185_v59  ;;  %2354 = vrcp.f32 %v3118_v2 }
 0x2a9   : > { %v2345_v3 = vpop.eup %2344  ;;  %v1262_v7 = vmul.f32 %v1246_v63, %v1214_v37  ;;  %v1229_v9 = vmul.f32 %v1213_v1, %v3080_v52  ;;  %v1204_v4 = vsub.f32 2.0, %v1188_v46  ;;  %v1275_v13 = vmul.f32 %v3001_v36, %v1259_v45 }
 0x2aa   : > { %v2347_v14 = vpop.eup %2346  ;;  %v1250_v10 = vsub.f32 2.0, %v1234_v5  ;;  %v1217_v21 = vmul.f32 %v2341_v34, %v1201_v43  ;;  %v1192_v23 = vmul.f32 %v2345_v3, %v3090_v11  ;;  %v3127_v25 = vpop.xlane.xlu1 %1161  ;;  %v1279_v51 = vmul.f32 %v3011_v49, %v1263_v47 }
 0x2ab   : > { %v1245_v28 = vsub.f32 2.0, %v1229_v9  ;;  %v1220_v16 = vmul.f32 %v2343_v53, %v1204_v4  ;;  %v1187_v30 = vmul.f32 %v2347_v14, %v3093_v8  ;;  %2141 = vmatprep.mubr.msk.f32.mxu0 %vm1018_vm8, %v1275_v13  ;;  %1695 = vst.msk [vmem:[%s3099_s5] sm:$0xff] %vm1018_vm8, %v1275_v13  ;;  %2356 = vrcp.f32 %v3127_v25 }
 0x2ac   : > { %v1266_v36 = vmul.f32 %v1250_v10, %v1218_v57  ;;  %v1233_v52 = vmul.f32 %v1217_v21, %v3083_v60  ;;  %v1208_v31 = vsub.f32 2.0, %v1192_v23  ;;  %2142 = vmatmul.mubr.msk.f32.vlgmr.msra.gmra.mrb[8].mxu0 %vm1018_vm8, %v1276_v19  ;;  %2151 = vmatprep.mubr.msk.f32.mxu1 %vm1018_vm8, %v1279_v51  ;;  %1699 = vst.msk [vmem:[%s3099_s5 + $0x20] sm:$0xff] %vm1018_vm8, %v1279_v51 }
 0x2ad   : > { %v1278_v49 = vmul.f32 %v3015_v54, %v1262_v7  ;;  %v2349_v32 = vpop.eup %2348  ;;  %v1261_v33 = vmul.f32 %v1245_v28, %v1213_v1  ;;  %v1236_v26 = vmul.f32 %v1220_v16, %v3086_v62  ;;  %v1203_v37 = vsub.f32 2.0, %v1187_v30  ;;  %2152 = vmatmul.mubr.msk.f32.vlgmr.msra.gmra.mrb[8].mxu1 %vm1018_vm8, %v1280_v55  ;;  %2212 = vmatpush3.bf16.msra.mxu0 %v3071_v39 }
 0x2ae   : > { %v2351_v60 = vpop.eup %2350  ;;  %v1249_v38 = vsub.f32 2.0, %v1233_v52  ;;  %v1224_v40 = vmul.f32 %v2345_v3, %v1208_v31  ;;  %v1191_v19 = vmul.f32 %v2349_v32, %v3103_v20  ;;  %v1282_v54 = vmul.f32 %v3019_v58, %v1266_v36  ;;  %2216 = vmatpush3.bf16.msra.mxu1 %v3074_v41 }
 0x2af   : > { %1698 = vst.msk [vmem:[%s3099_s5 + $0x18] sm:$0xff] %vm1018_vm8, %v1278_v49  ;;  %v1252_v42 = vsub.f32 2.0, %v1236_v26  ;;  %v1219_v62 = vmul.f32 %v2347_v14, %v1203_v37  ;;  %v1189_v44 = vmul.f32 %v2351_v60, %v3107_v35  ;;  %v1277_v34 = vmul.f32 %v3025_v0, %v1261_v33 }
 0x2b0   : > { %v1265_v45 = vmul.f32 %v1249_v38, %v1217_v21  ;;  %v1240_v39 = vmul.f32 %v1224_v40, %v3090_v11  ;;  %v1207_v48 = vsub.f32 2.0, %v1191_v19  ;;  %1702 = vst.msk [vmem:[%s3099_s5 + $0x38] sm:$0xff] %vm1018_vm8, %v1282_v54 }
 0x2b1   : > { %v2353_v50 = vpop.eup %2352  ;;  %v1268_v53 = vmul.f32 %v1252_v42, %v1220_v16  ;;  %v1235_v55 = vmul.f32 %v1219_v62, %v3093_v8  ;;  %v1205_v56 = vsub.f32 2.0, %v1189_v44  ;;  %2144 = vmatprep.mubr.msk.f32.mxu0 %vm1018_vm8, %v1277_v34  ;;  %1697 = vst.msk [vmem:[%s3099_s5 + $0x10] sm:$0xff] %vm1018_vm8, %v1277_v34 }
 0x2b2   : > { %v2355_v58 = vpop.eup %2354  ;;  %v1256_v41 = vsub.f32 2.0, %v1240_v39  ;;  %v1223_v0 = vmul.f32 %v2349_v32, %v1207_v48  ;;  %v1193_v57 = vmul.f32 %v2353_v50, %v3114_v61  ;;  %2145 = vmatmul.mubr.msk.f32.gmra.mrb[10].mxu0 %vm1018_vm8, %v1278_v49  ;;  %v1281_v11 = vmul.f32 %v3029_v6, %v1265_v45 }
 0x2b3   : > { %v1284_v59 = vmul.f32 %v3035_v12, %v1268_v53  ;;  %v1251_v63 = vsub.f32 2.0, %v1235_v55  ;;  %v1221_v8 = vmul.f32 %v2351_v60, %v1205_v56  ;;  %v1190_v1 = vmul.f32 %v2355_v58, %v3118_v2 }
 0x2b4   : > { %v1272_v46 = vmul.f32 %v1256_v41, %v1224_v40  ;;  %v1239_v47 = vmul.f32 %v1223_v0, %v3103_v20  ;;  %v1209_v5 = vsub.f32 2.0, %v1193_v57  ;;  %2154 = vmatprep.mubr.msk.f32.mxu1 %vm1018_vm8, %v1281_v11  ;;  %1701 = vst.msk [vmem:[%s3099_s5 + $0x30] sm:$0xff] %vm1018_vm8, %v1281_v11 }
 0x2b5   : > { %v2357_v43 = vpop.eup %2356  ;;  %1704 = vst.msk [vmem:[%s3099_s5 + $0x48] sm:$0xff] %vm1018_vm8, %v1284_v59  ;;  %v1267_v3 = vmul.f32 %v1251_v63, %v1219_v62  ;;  %v1237_v6 = vmul.f32 %v1221_v8, %v3107_v35  ;;  %v1206_v12 = vsub.f32 2.0, %v1190_v1  ;;  %2155 = vmatmul.mubr.msk.f32.gmra.mrb[10].mxu1 %vm1018_vm8, %v1282_v54 }
 0x2b6   : > { %v1288_v7 = vmul.f32 %v3039_v15, %v1272_v46  ;;  %v1255_v9 = vsub.f32 2.0, %v1239_v47  ;;  %v1225_v20 = vmul.f32 %v2353_v50, %v1209_v5  ;;  %v1194_v4 = vmul.f32 %v2357_v43, %v3127_v25 }
 0x2b7   : > { %v1253_v13 = vsub.f32 2.0, %v1237_v6  ;;  %v1222_v14 = vmul.f32 %v2355_v58, %v1206_v12  ;;  %v1283_v10 = vmul.f32 %v3043_v17, %v1267_v3 }
 0x2b8   : > { %1708 = vst.msk [vmem:[%s3099_s5 + $0x68] sm:$0xff] %vm1018_vm8, %v1288_v7  ;;  %v1271_v21 = vmul.f32 %v1255_v9, %v1223_v0  ;;  %v1241_v35 = vmul.f32 %v1225_v20, %v3114_v61  ;;  %v1210_v23 = vsub.f32 2.0, %v1194_v4 }
 0x2b9   : > { %v1269_v51 = vmul.f32 %v1253_v13, %v1221_v8  ;;  %v1238_v28 = vmul.f32 %v1222_v14, %v3118_v2  ;;  %2161 = vmatprep.mubr.msk.f32.mxu0 %vm1018_vm8, %v1283_v10  ;;  %1703 = vst.msk [vmem:[%s3099_s5 + $0x40] sm:$0xff] %vm1018_vm8, %v1283_v10 }
 0x2ba   : > { %v1257_v15 = vsub.f32 2.0, %v1241_v35  ;;  %v1226_v16 = vmul.f32 %v2357_v43, %v1210_v23  ;;  %2162 = vmatmul.mubr.msk.f32.vlgmr.msra.gmra.mrb[12].mxu0 %vm1018_vm8, %v1284_v59  ;;  %v1287_v17 = vmul.f32 %v3047_v18, %v1271_v21 }
 0x2bb   : > { %v1254_v30 = vsub.f32 2.0, %v1238_v28  ;;  %v1285_v61 = vmul.f32 %v3051_v22, %v1269_v51 }
 0x2bc   : > { %v1273_v36 = vmul.f32 %v1257_v15, %v1225_v20  ;;  %v1242_v52 = vmul.f32 %v1226_v16, %v3127_v25  ;;  %2171 = vmatprep.mubr.msk.f32.mxu1 %vm1018_vm8, %v1287_v17  ;;  %1707 = vst.msk [vmem:[%s3099_s5 + $0x60] sm:$0xff] %vm1018_vm8, %v1287_v17 }
 0x2bd   : > { %v1270_v2 = vmul.f32 %v1254_v30, %v1222_v14  ;;  %2164 = vmatprep.mubr.msk.f32.mxu0 %vm1018_vm8, %v1285_v61  ;;  %1705 = vst.msk [vmem:[%s3099_s5 + $0x50] sm:$0xff] %vm1018_vm8, %v1285_v61  ;;  %2172 = vmatmul.mubr.msk.f32.vlgmr.msra.gmra.mrb[12].mxu1 %vm1018_vm8, %v1288_v7 }
 0x2be   : > { %v1258_v18 = vsub.f32 2.0, %v1242_v52  ;;  %v1289_v31 = vmul.f32 %v3055_v24, %v1273_v36 }
 0x2bf   : > { %v1286_v22 = vmul.f32 %v3059_v27, %v1270_v2 }
 0x2c0   : > { %v1274_v49 = vmul.f32 %v1258_v18, %v1226_v16  ;;  %2174 = vmatprep.mubr.msk.f32.mxu1 %vm1018_vm8, %v1289_v31  ;;  %1709 = vst.msk [vmem:[%s3099_s5 + $0x70] sm:$0xff] %vm1018_vm8, %v1289_v31 }
 0x2c1   : > { %1706 = vst.msk [vmem:[%s3099_s5 + $0x58] sm:$0xff] %vm1018_vm8, %v1286_v22  ;;  %2165 = vmatmul.mubr.msk.f32.gmra.mrb[14].mxu0 %vm1018_vm8, %v1286_v22 }
 0x2c2   : > { %v1290_v25 = vmul.f32 %v3063_v29, %v1274_v49 }
 0x2c4   : > { %1710 = vst.msk [vmem:[%s3099_s5 + $0x78] sm:$0xff] %vm1018_vm8, %v1290_v25  ;;  %2175 = vmatmul.mubr.msk.f32.gmra.mrb[14].mxu1 %vm1018_vm8, %v1290_v25 }
 0x37f   : > { %v2143_v32 = vpop.f32.mrb[8].mxu0 }
 0x380   : > { %1680 = vst.msk [vmem:[%s3206_s14 + $0x8] sm:$0xff] %vm550_vm0, %v2143_v32  ;;  %v1369_v24 = vpop.f32.mrb[9].mxu0  ;;  %v2153_v27 = vpop.f32.mrb[8].mxu1 }
 0x381   : > { %1679 = vst.msk [vmem:[%s3206_s14] sm:$0xff] %vm550_vm0, %v1369_v24  ;;  %1684 = vst.msk [vmem:[%s3206_s14 + $0x28] sm:$0xff] %vm550_vm0, %v2153_v27  ;;  %v1466_v29 = vpop.f32.mrb[9].mxu1 }
 0x382   : > { %1683 = vst.msk [vmem:[%s3206_s14 + $0x20] sm:$0xff] %vm550_vm0, %v1466_v29 }
 0x385   : > { %v2146_v33 = vpop.f32.mrb[10].mxu0 }
 0x386   : > { %1682 = vst.msk [vmem:[%s3206_s14 + $0x18] sm:$0xff] %vm550_vm0, %v2146_v33  ;;  %v1379_v26 = vpop.f32.mrb[11].mxu0 }
 0x387   : > { %1681 = vst.msk [vmem:[%s3206_s14 + $0x10] sm:$0xff] %vm550_vm0, %v1379_v26 }
 0x388   : > { %v2156_v37 = vpop.f32.mrb[10].mxu1 }
 0x389   : > { %1686 = vst.msk [vmem:[%s3206_s14 + $0x38] sm:$0xff] %vm550_vm0, %v2156_v37  ;;  %v1476_v60 = vpop.f32.mrb[11].mxu1 }
 0x38a   : > { %1685 = vst.msk [vmem:[%s3206_s14 + $0x30] sm:$0xff] %vm550_vm0, %v1476_v60 }
 0x38d   : > { %v2163_v38 = vpop.f32.mrb[12].mxu0 }
 0x38e   : > { %1688 = vst.msk [vmem:[%s3206_s14 + $0x48] sm:$0xff] %vm550_vm0, %v2163_v38  ;;  %v1563_v40 = vpop.f32.mrb[13].mxu0 }
 0x38f   : > { %1687 = vst.msk [vmem:[%s3206_s14 + $0x40] sm:$0xff] %vm550_vm0, %v1563_v40 }
 0x390   : > { %v2173_v19 = vpop.f32.mrb[12].mxu1 }
 0x391   : > { %1692 = vst.msk [vmem:[%s3206_s14 + $0x68] sm:$0xff] %vm550_vm0, %v2173_v19  ;;  %v1660_v54 = vpop.f32.mrb[13].mxu1 }
 0x392   : > { %1691 = vst.msk [vmem:[%s3206_s14 + $0x60] sm:$0xff] %vm550_vm0, %v1660_v54 }
 0x394   : > { %v2166_v42 = vpop.f32.mrb[14].mxu0 }
 0x395   : > { %1690 = vst.msk [vmem:[%s3206_s14 + $0x58] sm:$0xff] %vm550_vm0, %v2166_v42  ;;  %v1573_v62 = vpop.f32.mrb[15].mxu0 }
 0x396   : > { %1689 = vst.msk [vmem:[%s3206_s14 + $0x50] sm:$0xff] %vm550_vm0, %v1573_v62 }
 0x397   : > { %v2176_v44 = vpop.f32.mrb[14].mxu1 }
 0x398   : > { %1694 = vst.msk [vmem:[%s3206_s14 + $0x78] sm:$0xff] %vm550_vm0, %v2176_v44  ;;  %v1670_v34 = vpop.f32.mrb[15].mxu1 }
 0x399   : > { %1693 = vst.msk [vmem:[%s3206_s14 + $0x70] sm:$0xff] %vm550_vm0, %v1670_v34 }
 0x39a   : > { %2461 = shalt.err (!%p2458_p7)
}
 0x39b   : > { %s2462_s19 = scalar_lea.hbm %s3241_s27, 2048  ;;  %s2466_s29 = scalar_lea.hbm %s3344_s8, 4096 }
 0x39c   : > { %p2463_p11 = scmp.ne.s32.totalorder %s3241_s27, %s2462_s19  ;;  %p2467_p2 = scmp.lt.u32.totalorder %s3241_s27, %s3344_s8 }
 0x39d   : > { %p2468_p1 = scmp.lt.u32.totalorder %s2466_s29, %s2462_s19  ;;  %p2470_p6 = scmp.lt.u32.totalorder %s2462_s19, %s3241_s27 }
 0x39e   : > { %p2464_p3 = pnand %p2463_p11, %p3345_p8 }
 0x39f   : > { %p2469_p0 = por %p2468_p1, %p2467_p2 }
 0x3a0   : > { %p2465_p5 = pneg %p2464_p3 }
 0x3a1   : > { %p2471_p9 = por %p2470_p6, %p2469_p0 }
 0x3a3   : > { %p2472_p12 = pnand %p2471_p9, %p2465_p5 }
 0x3a5   : > { %2475 = shalt.err (!%p2472_p12)
}
 0x3a6   : > { %s2543_s1 = smov 128   ;;  %s2544_s15 = smov 8  }
 0x3a7   : > { %2223 = dma.vmem_to_hbm [thread:$0]  (%p3345_p8), %s3243_s23, 2048, %s3241_s27, %s1712_s24, %s2543_s1, %s2543_s1, %s2544_s15  }
 0x3a8 PF: > { %s3346_s5 = sld [smem:[#allocation12_spill]]  ;;  %s3347_s14 = sld [smem:[#allocation16_spill]] }
 0x3a9   : > { %p3349_p10 = scmp.ge.s32.totalorder %s2534_s26, 2 }
 0x3ae   : > { %s1764_s17 = sand.u32 1, %s3346_s5   ;;  %p3348_p4 = scmp.ne.s32.totalorder %s3347_s14, 0 }
 0x3af   : > { %s1765_s11 = scalar_lea.sflag [#allocation4], %s1764_s17 }
 0x3b0   : > { %p2236_p13 = pnand %p3349_p10, %p3348_p4 }
 0x3b2   : > { %2509 = dma.done.wait (!%p2236_p13), %s1765_s11, 2048  }
 0x3b3   : > { %2511 = vsyncadd (!%p2236_p13), %s1765_s11, 4294965248  ;;  %s26_s26 = sadd.s32 1, %s2534_s26   ;;  %s3350_s7 = sld [smem:[#allocation13_spill]] }
 0x3b4   : > { %p23_p7 = scmp.ge.s32.totalorder %s26_s26, 4   ;;  %s3351_s23 = sld [smem:[#allocation15_spill]] }
 0x3b5   : > { %s3352_s10 = sld [smem:[#allocation14_spill]]  ;;  %s3353_s21 = smov %s2518_s22 }
 0x3b6   : > { %s3355_s24 = smov %s2530_s25  ;;  %25 = sbr.rel (!%p23_p7) target bundleno = 11 (0xb), region = 127 }
 0x3b9   : > { %s3354_s22 = smov %s3350_s7 }
 0x3bb   : > { %s3356_s25 = smov %s3352_s10 }
 0x3bd   :  { %1787 = vsyncpa [#allocation3], 1 }
 0x3be   :  { %1789 = vsyncpa [#allocation3 + $0x1], 1 }
 0x3bf   :  { %1790 = vsyncpa [#allocation6], 1 }
 0x3c0   :  { %1792 = vsyncpa [#allocation6 + $0x1], 1 }
 0x3c1   :  { %1793 = vsyncpa [#allocation4], 1 }
 0x3c2   :  { %1795 = vsyncpa [#allocation4 + $0x1], 1 }

</bundles_post_ra>
